<compile_context>
chip_gen: v7x
topology: tpu7x:2x2x1
jax: 0.10.0
libtpu: 0.0.40
codegen_flags: <defaults>
</compile_context>

<pallas_src>
import jax
import jax.numpy as jnp
import numpy as np
from jax.experimental import pallas as pl
from jax.experimental.pallas import tpu as pltpu

DILATIONS = (1, 3, 9)
_HPADS = (16, 16, 32)   # per-ResUnit history pad rows (>= 2*d, sublane aligned)
_UP_HPAD = 16           # upsample history pad rows (needs 1 row, kept aligned)


def _elu(x):
    # torch.nn.ELU(alpha=1) applied to the f32 accumulator.
    return jnp.where(x > 0, x, jnp.exp(x) - 1.0)


# ----------------------------- Pallas kernels ------------------------------

def _upsample_kernel(x_ref, m01_ref, b_ref, o_ref, buf):
    """ConvTranspose1d(k=2S, stride=S) + crop(S) + ELU for one (batch, tile).

    y[q*S + r, :] = x[q] @ W[:,:,r] + x[q-1] @ W[:,:,S+r] + b, emitted as row
    q / channel-block r of a (tile_t, S*C) tile (the free row-major reshape to
    (tile_t*S, C) happens in the wrapper).  x[q-1] at the tile boundary comes
    from a persistent aligned working buffer carried across time tiles
    (zeros at tile 0 == causal start).
    """
    j = pl.program_id(1)
    xt = x_ref[0]                                       # (tile_t, Cin) bf16
    tile_t, cin = xt.shape

    @pl.when(j == 0)
    def _():
        buf[tile_t:tile_t + _UP_HPAD, :] = jnp.zeros((_UP_HPAD, cin), buf.dtype)

    hist = buf[tile_t:tile_t + _UP_HPAD, :]             # prev tile's last rows
    buf[0:_UP_HPAD, :] = hist
    buf[_UP_HPAD:_UP_HPAD + tile_t, :] = xt             # aligned store
    x_prev = buf[_UP_HPAD - 1:_UP_HPAD - 1 + tile_t, :]  # x[q-1]

    xcat = jnp.concatenate([xt, x_prev], axis=1)        # (tile_t, 2*Cin)
    y = (jnp.dot(xcat, m01_ref[...], preferred_element_type=jnp.float32)
         + b_ref[...])                                  # f32 accumulator
    o_ref[0] = _elu(y).astype(o_ref.dtype)


def _resunits_kernel(x_ref, wxs_ref, bxs_ref, wsh_ref, wo_ref, bo_ref, o_ref,
                     buf0, buf1, buf2):
    """Three fused ResUnits (dilations 1, 3, 9) on one (batch, time-tile).

    Per unit:  hs = x @ [A2 | Ws] + [b_in | b_sc]          (K=C, N=2C)
               h  = ELU(hs[:, :C] + x_2d @ A0 + x_d @ A1)  (two (C,C) taps)
               h  = ELU(h @ Wo + b_out);  out = ELU(hs[:, C:]) + h
    Causal taps come from a persistent aligned working buffer per unit that
    carries the last HPAD rows of that unit's input across time tiles
    (zeros at tile 0 == causal zero pad).
    """
    j = pl.program_id(1)
    bufs = (buf0, buf1, buf2)
    x = x_ref[0]                                        # (tile_l, C) bf16
    tile_l, c = x.shape

    @pl.when(j == 0)
    def _():
        for buf, hp in zip(bufs, _HPADS):
            buf[tile_l:tile_l + hp, :] = jnp.zeros((hp, c), buf.dtype)

    out = None
    for i, d in enumerate(DILATIONS):
        buf, hp = bufs[i], _HPADS[i]
        hist = buf[tile_l:tile_l + hp, :]               # last hp rows of prev input
        buf[0:hp, :] = hist                             # aligned carry copy
        buf[hp:hp + tile_l, :] = x                      # aligned store of tile
        x_2d = buf[hp - 2 * d:hp - 2 * d + tile_l, :]   # x[t - 2d]
        x_d = buf[hp - d:hp - d + tile_l, :]            # x[t - d]

        hs = (jnp.dot(x, wxs_ref[i], preferred_element_type=jnp.float32)
              + bxs_ref[i])                             # (tile_l, 2C) f32
        h_pre = (hs[:, :c]
                 + jnp.dot(x_2d, wsh_ref[2 * i], preferred_element_type=jnp.float32)
                 + jnp.dot(x_d, wsh_ref[2 * i + 1], preferred_element_type=jnp.float32))
        s = _elu(hs[:, c:])                             # shortcut + ELU (f32)
        h = _elu(h_pre).astype(x.dtype)                 # conv_in + ELU -> bf16
        h = _elu(jnp.dot(h, wo_ref[i], preferred_element_type=jnp.float32)
                 + bo_ref[i])                           # conv_out + ELU (f32)
        out = s + h                                     # residual in f32
        x = out.astype(x.dtype)                         # bf16 for next unit
    o_ref[0] = out.astype(o_ref.dtype)


# ------------------------------ call wrappers -------------------------------

def _nbytes(shape, dtype):
    return int(np.prod(shape)) * jnp.dtype(dtype).itemsize


def _compiler_params(block_bytes):
    # Explicit VMEM budget: double-buffered blocks + slack for temporaries,
    # capped well below the smallest physical VMEM (v7x: 64 MiB physical).
    limit = int(min(max(block_bytes + (8 << 20), 16 << 20), 96 << 20))
    return pltpu.CompilerParams(
        dimension_semantics=("parallel", "arbitrary"),
        vmem_limit_bytes=limit)


def _upsample_call(x, m01, b, tile_t):
    B, T, Cin = x.shape
    N = m01.shape[1]                                    # N = S*C
    block_bytes = 2 * (_nbytes((tile_t, Cin), x.dtype)
                       + _nbytes(m01.shape, m01.dtype)
                       + _nbytes(b.shape, b.dtype)
                       + _nbytes((tile_t, N), x.dtype)) \
        + _nbytes((tile_t + _UP_HPAD, Cin), x.dtype)
    return pl.pallas_call(
        _upsample_kernel,
        out_shape=jax.ShapeDtypeStruct((B, T, N), x.dtype),
        grid=(B, T // tile_t),
        in_specs=[
            pl.BlockSpec((1, tile_t, Cin), lambda b_, j: (b_, j, 0)),
            pl.BlockSpec((2 * Cin, N), lambda b_, j: (0, 0)),
            pl.BlockSpec((1, N), lambda b_, j: (0, 0)),
        ],
        out_specs=pl.BlockSpec((1, tile_t, N), lambda b_, j: (b_, j, 0)),
        scratch_shapes=[pltpu.VMEM((tile_t + _UP_HPAD, Cin), x.dtype)],
        compiler_params=_compiler_params(block_bytes),
    )(x, m01, b)


def _resunits_call(y, wxs, bxs, wsh, wo, bo, tile_l, out_dtype):
    B, L, C = y.shape
    block_bytes = 2 * (_nbytes((tile_l, C), y.dtype)
                       + _nbytes((tile_l, C), out_dtype)
                       + _nbytes(wxs.shape, wxs.dtype)
                       + _nbytes(bxs.shape, bxs.dtype)
                       + _nbytes(wsh.shape, wsh.dtype)
                       + _nbytes(wo.shape, wo.dtype)
                       + _nbytes(bo.shape, bo.dtype)) \
        + sum(_nbytes((tile_l + hp, C), y.dtype) for hp in _HPADS)
    return pl.pallas_call(
        _resunits_kernel,
        out_shape=jax.ShapeDtypeStruct((B, L, C), out_dtype),
        grid=(B, L // tile_l),
        in_specs=[
            pl.BlockSpec((1, tile_l, C), lambda b_, j: (b_, j, 0)),
            pl.BlockSpec((3, C, 2 * C), lambda b_, j: (0, 0, 0)),
            pl.BlockSpec((3, 1, 2 * C), lambda b_, j: (0, 0, 0)),
            pl.BlockSpec((6, C, C), lambda b_, j: (0, 0, 0)),
            pl.BlockSpec((3, C, C), lambda b_, j: (0, 0, 0)),
            pl.BlockSpec((3, 1, C), lambda b_, j: (0, 0, 0)),
        ],
        out_specs=pl.BlockSpec((1, tile_l, C), lambda b_, j: (b_, j, 0)),
        scratch_shapes=[pltpu.VMEM((tile_l + hp, C), y.dtype) for hp in _HPADS],
        compiler_params=_compiler_params(block_bytes),
    )(y, wxs, bxs, wsh, wo, bo)


# --------------------------------- glue ------------------------------------

def _weight_norm(v, g, dim=0):
    axes = tuple(i for i in range(v.ndim) if i != dim)
    norm = jnp.sqrt(jnp.sum(v * v, axis=axes, keepdims=True))
    return g * v / norm


def _pick_tile(total, want, base=16):
    """Largest divisor of `total` that is a multiple of `base` and <= want.

    Only spans the full dim when `total` itself is not base-aligned (in which
    case a full-extent block is the only legal choice)."""
    if total % base != 0:
        return total
    want = max(base, min(want - want % base, total))
    for cand in range(want, base - 1, -base):
        if total % cand == 0:
            return cand
    return total


def dec_block_forward(x_ncw, params, stride, *, tile_t=256, tile_l=1024,
                      compute_dtype=jnp.bfloat16):
    """x_ncw: (B, 2*C, T) float32 (PyTorch NCW). Returns (B, C, T*stride) f32."""
    B, Cin, T = x_ncw.shape
    C = Cin // 2
    S = stride
    L = T * S
    tile_t = _pick_tile(T, tile_t)
    tile_l = _pick_tile(L, tile_l)
    cdt = compute_dtype

    x = jnp.transpose(x_ncw, (0, 2, 1)).astype(cdt)              # (B, T, Cin)

    # --- ConvTransposed1d(k=2S, stride=S) + crop(S) as ONE fused matmul ---
    W = _weight_norm(params["t_v"], params["t_g"], dim=0)        # (Cin, C, 2S)
    m0 = jnp.transpose(W[:, :, :S], (0, 2, 1)).reshape(Cin, S * C)   # taps r
    m1 = jnp.transpose(W[:, :, S:], (0, 2, 1)).reshape(Cin, S * C)   # taps S+r
    m01 = jnp.concatenate([m0, m1], axis=0).astype(cdt)          # (2*Cin, S*C)
    bflat = jnp.tile(params["t_b"], S).reshape(1, S * C).astype(jnp.float32)

    y = _upsample_call(x, m01, bflat, tile_t)                    # (B, T, S*C) bf16
    y = y.reshape(B, L, C)                                       # free reshape

    # --- ResUnit weights (zero block removed):
    #       wxs = [A2 | Ws] (C, 2C)   current-tap conv_in + 1x1 shortcut
    #       wsh = [A0, A1]  (2*(C,C)) taps at t-2d / t-d
    wxs, wsh, wo_all, bxs, bo_all = [], [], [], [], []
    for i in range(3):
        p = params["res"][i]
        A = jnp.transpose(_weight_norm(p["in_v"], p["in_g"], 0), (2, 1, 0))  # (3, C, C)
        Ws = _weight_norm(p["sc_v"], p["sc_g"], 0)[:, :, 0].T
        Wo = _weight_norm(p["out_v"], p["out_g"], 0)[:, :, 0].T
        wxs.append(jnp.concatenate([A[2], Ws], axis=1))          # (C, 2C)
        wsh.extend([A[0], A[1]])                                 # 2 x (C, C)
        wo_all.append(Wo)
        bxs.append(jnp.concatenate([p["in_b"], p["sc_b"]]).reshape(1, 2 * C))
        bo_all.append(p["out_b"].reshape(1, C))
    wxs = jnp.stack(wxs).astype(cdt)                             # (3, C, 2C)
    wsh = jnp.stack(wsh).astype(cdt)                             # (6, C, C)
    wo_all = jnp.stack(wo_all).astype(cdt)                       # (3, C, C)
    bxs = jnp.stack(bxs).astype(jnp.float32)                     # (3, 1, 2C)
    bo_all = jnp.stack(bo_all).astype(jnp.float32)               # (3, 1, C)

    y = _resunits_call(y, wxs, bxs, wsh, wo_all, bo_all, tile_l, jnp.float32)
    return jnp.transpose(y, (0, 2, 1))                           # (B, C, L) f32


# ---------------------- deterministic parameter init -----------------------

def init_params(key, out_channels, stride):
    C, S = out_channels, stride
    Cin, K = 2 * C, 2 * S
    keys = iter(jax.random.split(key, 64))

    def nrm(shape, scale=0.2):
        return scale * jax.random.normal(next(keys), shape, jnp.float32)

    def gain(shape):
        return jax.random.uniform(next(keys), shape, jnp.float32, 0.5, 1.5)

    params = {
        "t_v": nrm((Cin, C, K)),        # ConvTranspose1d weight_v (in, out, k)
        "t_g": gain((Cin, 1, 1)),       # weight_norm g (dim=0)
        "t_b": nrm((C,), 0.1),
        "res": [],
    }
    for _ in range(3):
        params["res"].append({
            "in_v": nrm((C, C, 3)),  "in_g": gain((C, 1, 1)),  "in_b": nrm((C,), 0.1),
            "out_v": nrm((C, C, 1)), "out_g": gain((C, 1, 1)), "out_b": nrm((C,), 0.1),
            "sc_v": nrm((C, C, 1)),  "sc_g": gain((C, 1, 1)),  "sc_b": nrm((C,), 0.1),
        })
    return params


# ------------------------- pure-JAX reference (NCW) ------------------------

_HI = jax.lax.Precision.HIGHEST


def _ref_causal_conv(x, W, b, dilation):
    # x: (B, C, T), W: (Cout, Cin, K), left pad (K-1)*dilation (causal)
    K = W.shape[2]
    pad = (K - 1) * dilation
    xp = jnp.pad(x, ((0, 0), (0, 0), (pad, 0)))
    T = x.shape[2]
    acc = jnp.zeros((x.shape[0], W.shape[0], T), jnp.float32)
    for k in range(K):
        acc = acc + jnp.einsum("bct,dc->bdt",
                               xp[:, :, k * dilation:k * dilation + T],
                               W[:, :, k], precision=_HI)
    return acc + b[None, :, None]


def _ref_elu(x):
    return jnp.where(x > 0, x, jnp.exp(jnp.minimum(x, 0.0)) - 1.0)


def _ref_res_unit(x, p, d):
    Wi = _weight_norm(p["in_v"], p["in_g"], 0)
    Wo = _weight_norm(p["out_v"], p["out_g"], 0)
    Ws = _weight_norm(p["sc_v"], p["sc_g"], 0)
    y = _ref_elu(_ref_causal_conv(x, Wi, p["in_b"], d))
    y = _ref_elu(_ref_causal_conv(y, Wo, p["out_b"], 1))
    s = _ref_elu(_ref_causal_conv(x, Ws, p["sc_b"], 1))
    return s + y


def ref_dec_block(x, params, stride):
    W = _weight_norm(params["t_v"], params["t_g"], 0)            # (Cin, C, K)
    B, Cin, T = x.shape
    _, C, K = W.shape
    L = (T - 1) * stride + K
    y = jnp.zeros((B, C, L), jnp.float32)
    for k in range(K):
        contrib = jnp.einsum("bct,cd->bdt", x, W[:, :, k], precision=_HI)
        y = y.at[:, :, k:k + (T - 1) * stride + 1:stride].add(contrib)
    y = y + params["t_b"][None, :, None]
    y = _ref_elu(y[..., :-stride])
    for i, d in enumerate(DILATIONS):
        y = _ref_res_unit(y, params["res"][i], d)
    return y


# --------------------------------- main -------------------------------------

if __name__ == "__main__":
    out_channels, stride = 8, 2
    B, T = 2, 32                      # L = 64 -> 2 upsample tiles, 2 res tiles

    key = jax.random.PRNGKey(0)
    kp, kx = jax.random.split(key)
    params = init_params(kp, out_channels, stride)
    x = jax.random.normal(kx, (B, 2 * out_channels, T), jnp.float32)  # NCW

    fwd = jax.jit(lambda x_, p_: dec_block_forward(
        x_, p_, stride, tile_t=16, tile_l=32))
    out = jax.block_until_ready(fwd(x, params))
    ref = jax.block_until_ready(ref_dec_block(x, params, stride))

    assert out.shape == (B, out_channels, T * stride), out.shape
    # bf16 matmul operands (f32 accumulation) -> slightly looser tolerance
    # than the pure-f32 variant.
    np.testing.assert_allclose(np.asarray(out), np.asarray(ref),
                               rtol=3e-2, atol=3e-2)
    print("KERNEL_OK")
</pallas_src>

<mosaic_0001>
module attributes {stable_mosaic.version = 11 : i64} {
  func.func @_upsample_kernel(%arg0: i32, %arg1: i32, %arg2: memref<1x16x16xbf16, #tpu.memory_space<vmem>>, %arg3: memref<32x16xbf16, #tpu.memory_space<vmem>>, %arg4: memref<1x16xf32, #tpu.memory_space<vmem>>, %arg5: memref<1x16x16xbf16, #tpu.memory_space<vmem>>, %arg6: memref<32x16xbf16, #tpu.memory_space<vmem>>) attributes {dimension_semantics = [#tpu.dimension_semantics<parallel>, #tpu.dimension_semantics<arbitrary>], iteration_bounds = array<i64: 2, 2>, scalar_prefetch = 0 : i64, scratch_operands = 1 : i64, tpu.core_type = #tpu.core_type<tc>, window_params = [{transform_indices = @transform_0, window_bounds = array<i64: 1, 16, 16>}, {pipeline_mode = #tpu.pipeline_mode<synchronous>, transform_indices = @transform_1, window_bounds = array<i64: 32, 16>}, {pipeline_mode = #tpu.pipeline_mode<synchronous>, transform_indices = @transform_2, window_bounds = array<i64: 1, 16>}, {transform_indices = @transform_3, window_bounds = array<i64: 1, 16, 16>}]} {
    %c0 = arith.constant 0 : index
    %c0_0 = arith.constant 0 : index
    %c0_1 = arith.constant 0 : index
    %0 = vector.load %arg2[%c0, %c0_0, %c0_1] : memref<1x16x16xbf16, #tpu.memory_space<vmem>>, vector<1x16x16xbf16>
    %1 = vector.shape_cast %0 : vector<1x16x16xbf16> to vector<16x16xbf16>
    %c0_i32 = arith.constant 0 : i32
    %2 = arith.cmpi eq, %arg1, %c0_i32 : i32
    %3 = arith.extui %2 : i1 to i32
    %c0_i32_2 = arith.constant 0 : i32
    %4 = arith.cmpi ne, %3, %c0_i32_2 : i32
    scf.if %4 {
      %cst_18 = arith.constant 0.000000e+00 : bf16
      %25 = vector.broadcast %cst_18 : bf16 to vector<16x16xbf16>
      %c16_19 = arith.constant 16 : index
      %c0_20 = arith.constant 0 : index
      %26 = vector.load %arg6[%c16_19, %c0_20] : memref<32x16xbf16, #tpu.memory_space<vmem>>, vector<16x16xbf16>
      tpu.vector_store %arg6[%c16_19, %c0_20], %25 {strides = array<i32>} : memref<32x16xbf16, #tpu.memory_space<vmem>>, vector<16x16xbf16>,
    } else {
    }
    %c16 = arith.constant 16 : index
    %c0_3 = arith.constant 0 : index
    %5 = vector.load %arg6[%c16, %c0_3] : memref<32x16xbf16, #tpu.memory_space<vmem>>, vector<16x16xbf16>
    %c0_4 = arith.constant 0 : index
    %c0_5 = arith.constant 0 : index
    %6 = vector.load %arg6[%c0_4, %c0_5] : memref<32x16xbf16, #tpu.memory_space<vmem>>, vector<16x16xbf16>
    tpu.vector_store %arg6[%c0_4, %c0_5], %5 {strides = array<i32>} : memref<32x16xbf16, #tpu.memory_space<vmem>>, vector<16x16xbf16>,
    %c16_6 = arith.constant 16 : index
    %c0_7 = arith.constant 0 : index
    %7 = vector.load %arg6[%c16_6, %c0_7] : memref<32x16xbf16, #tpu.memory_space<vmem>>, vector<16x16xbf16>
    tpu.vector_store %arg6[%c16_6, %c0_7], %1 {strides = array<i32>} : memref<32x16xbf16, #tpu.memory_space<vmem>>, vector<16x16xbf16>,
    %c15 = arith.constant 15 : index
    %c0_8 = arith.constant 0 : index
    %8 = vector.load %arg6[%c15, %c0_8] : memref<32x16xbf16, #tpu.memory_space<vmem>>, vector<16x16xbf16>
    %9 = tpu.concatenate %1, %8 in 1 : vector<16x16xbf16>, vector<16x16xbf16> -> vector<16x32xbf16>
    %c0_9 = arith.constant 0 : index
    %c0_10 = arith.constant 0 : index
    %10 = vector.load %arg3[%c0_9, %c0_10] : memref<32x16xbf16, #tpu.memory_space<vmem>>, vector<32x16xbf16>
    %cst = arith.constant dense<0.000000e+00> : vector<16x16xf32>
    %11 = tpu.matmul %9, %10, %cst {dimension_numbers = #tpu.dot_dimension_numbers<[1], [0], [0], [1], [0, 0, 1, 1], [], []>} : vector<16x32xbf16>, vector<32x16xbf16>, vector<16x16xf32> -> vector<16x16xf32>
    %c0_11 = arith.constant 0 : index
    %c0_12 = arith.constant 0 : index
    %12 = vector.load %arg4[%c0_11, %c0_12] : memref<1x16xf32, #tpu.memory_space<vmem>>, vector<1x16xf32>
    %13 = vector.broadcast %12 : vector<1x16xf32> to vector<16x16xf32>
    %14 = arith.addf %11, %13 : vector<16x16xf32>
    %cst_13 = arith.constant 0.000000e+00 : f32
    %15 = vector.broadcast %cst_13 : f32 to vector<16x16xf32>
    %16 = arith.cmpf ogt, %14, %15 : vector<16x16xf32>
    %17 = math.exp %14 : vector<16x16xf32>
    %cst_14 = arith.constant 1.000000e+00 : f32
    %18 = vector.broadcast %cst_14 : f32 to vector<16x16xf32>
    %19 = arith.subf %17, %18 : vector<16x16xf32>
    %20 = arith.select %16, %14, %19 : vector<16x16xi1>, vector<16x16xf32>
    %21 = arith.truncf %20 : vector<16x16xf32> to vector<16x16xbf16>
    %c0_15 = arith.constant 0 : index
    %c0_16 = arith.constant 0 : index
    %c0_17 = arith.constant 0 : index
    %22 = vector.load %arg5[%c0_15, %c0_16, %c0_17] : memref<1x16x16xbf16, #tpu.memory_space<vmem>>, vector<1x16x16xbf16>
    %23 = vector.shape_cast %22 : vector<1x16x16xbf16> to vector<16x16xbf16>
    %24 = vector.shape_cast %21 : vector<16x16xbf16> to vector<1x16x16xbf16>
    tpu.vector_store %arg5[%c0_15, %c0_16, %c0_17], %24 {strides = array<i32>} : memref<1x16x16xbf16, #tpu.memory_space<vmem>>, vector<1x16x16xbf16>,
    return
  }
  func.func @transform_0(%arg0: i32, %arg1: i32) -> (i32, i32, i32) {
    %c0_i32 = arith.constant 0 : i32
    %c0_i32_0 = arith.constant 0 : i32
    return %arg0, %arg1, %c0_i32 : i32, i32, i32
  }
  func.func @transform_1(%arg0: i32, %arg1: i32) -> (i32, i32) {
    %c0_i32 = arith.constant 0 : i32
    %c0_i32_0 = arith.constant 0 : i32
    %c0_i32_1 = arith.constant 0 : i32
    return %c0_i32, %c0_i32_0 : i32, i32
  }
  func.func @transform_2(%arg0: i32, %arg1: i32) -> (i32, i32) {
    %c0_i32 = arith.constant 0 : i32
    %c0_i32_0 = arith.constant 0 : i32
    %c0_i32_1 = arith.constant 0 : i32
    return %c0_i32, %c0_i32_0 : i32, i32
  }
  func.func @transform_3(%arg0: i32, %arg1: i32) -> (i32, i32, i32) {
    %c0_i32 = arith.constant 0 : i32
    %c0_i32_0 = arith.constant 0 : i32
    return %arg0, %arg1, %c0_i32 : i32, i32, i32
  }
}

module attributes {stable_mosaic.version = 11 : i64} {
  func.func @_resunits_kernel(%arg0: i32, %arg1: i32, %arg2: memref<1x32x8xbf16, #tpu.memory_space<vmem>>, %arg3: memref<3x8x16xbf16, #tpu.memory_space<vmem>>, %arg4: memref<3x1x16xf32, #tpu.memory_space<vmem>>, %arg5: memref<6x8x8xbf16, #tpu.memory_space<vmem>>, %arg6: memref<3x8x8xbf16, #tpu.memory_space<vmem>>, %arg7: memref<3x1x8xf32, #tpu.memory_space<vmem>>, %arg8: memref<1x32x8xf32, #tpu.memory_space<vmem>>, %arg9: memref<48x8xbf16, #tpu.memory_space<vmem>>, %arg10: memref<48x8xbf16, #tpu.memory_space<vmem>>, %arg11: memref<64x8xbf16, #tpu.memory_space<vmem>>) attributes {dimension_semantics = [#tpu.dimension_semantics<parallel>, #tpu.dimension_semantics<arbitrary>], iteration_bounds = array<i64: 2, 2>, scalar_prefetch = 0 : i64, scratch_operands = 3 : i64, tpu.core_type = #tpu.core_type<tc>, window_params = [{transform_indices = @transform_0, window_bounds = array<i64: 1, 32, 8>}, {pipeline_mode = #tpu.pipeline_mode<synchronous>, transform_indices = @transform_1, window_bounds = array<i64: 3, 8, 16>}, {pipeline_mode = #tpu.pipeline_mode<synchronous>, transform_indices = @transform_2, window_bounds = array<i64: 3, 1, 16>}, {pipeline_mode = #tpu.pipeline_mode<synchronous>, transform_indices = @transform_3, window_bounds = array<i64: 6, 8, 8>}, {pipeline_mode = #tpu.pipeline_mode<synchronous>, transform_indices = @transform_4, window_bounds = array<i64: 3, 8, 8>}, {pipeline_mode = #tpu.pipeline_mode<synchronous>, transform_indices = @transform_5, window_bounds = array<i64: 3, 1, 8>}, {transform_indices = @transform_6, window_bounds = array<i64: 1, 32, 8>}]} {
    %c0 = arith.constant 0 : index
    %c0_0 = arith.constant 0 : index
    %c0_1 = arith.constant 0 : index
    %0 = vector.load %arg2[%c0, %c0_0, %c0_1] : memref<1x32x8xbf16, #tpu.memory_space<vmem>>, vector<1x32x8xbf16>
    %1 = vector.shape_cast %0 : vector<1x32x8xbf16> to vector<32x8xbf16>
    %c0_i32 = arith.constant 0 : i32
    %2 = arith.cmpi eq, %arg1, %c0_i32 : i32
    %3 = arith.extui %2 : i1 to i32
    %c0_i32_2 = arith.constant 0 : i32
    %4 = arith.cmpi ne, %3, %c0_i32_2 : i32
    scf.if %4 {
      %cst_107 = arith.constant 0.000000e+00 : bf16
      %157 = vector.broadcast %cst_107 : bf16 to vector<16x8xbf16>
      %c32_108 = arith.constant 32 : index
      %c0_109 = arith.constant 0 : index
      %158 = vector.load %arg9[%c32_108, %c0_109] : memref<48x8xbf16, #tpu.memory_space<vmem>>, vector<16x8xbf16>
      tpu.vector_store %arg9[%c32_108, %c0_109], %157 {strides = array<i32>} : memref<48x8xbf16, #tpu.memory_space<vmem>>, vector<16x8xbf16>,
      %cst_110 = arith.constant 0.000000e+00 : bf16
      %159 = vector.broadcast %cst_110 : bf16 to vector<16x8xbf16>
      %c32_111 = arith.constant 32 : index
      %c0_112 = arith.constant 0 : index
      %160 = vector.load %arg10[%c32_111, %c0_112] : memref<48x8xbf16, #tpu.memory_space<vmem>>, vector<16x8xbf16>
      tpu.vector_store %arg10[%c32_111, %c0_112], %159 {strides = array<i32>} : memref<48x8xbf16, #tpu.memory_space<vmem>>, vector<16x8xbf16>,
      %cst_113 = arith.constant 0.000000e+00 : bf16
      %161 = vector.broadcast %cst_113 : bf16 to vector<32x8xbf16>
      %c32_114 = arith.constant 32 : index
      %c0_115 = arith.constant 0 : index
      %162 = vector.load %arg11[%c32_114, %c0_115] : memref<64x8xbf16, #tpu.memory_space<vmem>>, vector<32x8xbf16>
      tpu.vector_store %arg11[%c32_114, %c0_115], %161 {strides = array<i32>} : memref<64x8xbf16, #tpu.memory_space<vmem>>, vector<32x8xbf16>,
    } else {
    }
    %c32 = arith.constant 32 : index
    %c0_3 = arith.constant 0 : index
    %5 = vector.load %arg9[%c32, %c0_3] : memref<48x8xbf16, #tpu.memory_space<vmem>>, vector<16x8xbf16>
    %c0_4 = arith.constant 0 : index
    %c0_5 = arith.constant 0 : index
    %6 = vector.load %arg9[%c0_4, %c0_5] : memref<48x8xbf16, #tpu.memory_space<vmem>>, vector<16x8xbf16>
    tpu.vector_store %arg9[%c0_4, %c0_5], %5 {strides = array<i32>} : memref<48x8xbf16, #tpu.memory_space<vmem>>, vector<16x8xbf16>,
    %c16 = arith.constant 16 : index
    %c0_6 = arith.constant 0 : index
    %7 = vector.load %arg9[%c16, %c0_6] : memref<48x8xbf16, #tpu.memory_space<vmem>>, vector<32x8xbf16>
    tpu.vector_store %arg9[%c16, %c0_6], %1 {strides = array<i32>} : memref<48x8xbf16, #tpu.memory_space<vmem>>, vector<32x8xbf16>,
    %c14 = arith.constant 14 : index
    %c0_7 = arith.constant 0 : index
    %8 = vector.load %arg9[%c14, %c0_7] : memref<48x8xbf16, #tpu.memory_space<vmem>>, vector<32x8xbf16>
    %c15 = arith.constant 15 : index
    %c0_8 = arith.constant 0 : index
    %9 = vector.load %arg9[%c15, %c0_8] : memref<48x8xbf16, #tpu.memory_space<vmem>>, vector<32x8xbf16>
    %c0_9 = arith.constant 0 : index
    %c0_10 = arith.constant 0 : index
    %c0_11 = arith.constant 0 : index
    %10 = vector.load %arg3[%c0_9, %c0_10, %c0_11] : memref<3x8x16xbf16, #tpu.memory_space<vmem>>, vector<1x8x16xbf16>
    %11 = vector.shape_cast %10 : vector<1x8x16xbf16> to vector<8x16xbf16>
    %cst = arith.constant dense<0.000000e+00> : vector<32x16xf32>
    %12 = tpu.matmul %1, %11, %cst {dimension_numbers = #tpu.dot_dimension_numbers<[1], [0], [0], [1], [0, 0, 1, 1], [], []>} : vector<32x8xbf16>, vector<8x16xbf16>, vector<32x16xf32> -> vector<32x16xf32>
    %c0_12 = arith.constant 0 : index
    %c0_13 = arith.constant 0 : index
    %c0_14 = arith.constant 0 : index
    %13 = vector.load %arg4[%c0_12, %c0_13, %c0_14] : memref<3x1x16xf32, #tpu.memory_space<vmem>>, vector<1x1x16xf32>
    %14 = vector.shape_cast %13 : vector<1x1x16xf32> to vector<1x16xf32>
    %15 = vector.broadcast %14 : vector<1x16xf32> to vector<32x16xf32>
    %16 = arith.addf %12, %15 : vector<32x16xf32>
    %17 = vector.extract_strided_slice %16 {offsets = [0, 0], sizes = [32, 8], strides = [1, 1]} : vector<32x16xf32> to vector<32x8xf32>
    %c0_15 = arith.constant 0 : index
    %c0_16 = arith.constant 0 : index
    %c0_17 = arith.constant 0 : index
    %18 = vector.load %arg5[%c0_15, %c0_16, %c0_17] : memref<6x8x8xbf16, #tpu.memory_space<vmem>>, vector<1x8x8xbf16>
    %19 = vector.shape_cast %18 : vector<1x8x8xbf16> to vector<8x8xbf16>
    %cst_18 = arith.constant dense<0.000000e+00> : vector<32x8xf32>
    %20 = tpu.matmul %8, %19, %cst_18 {dimension_numbers = #tpu.dot_dimension_numbers<[1], [0], [0], [1], [0, 0, 1, 1], [], []>} : vector<32x8xbf16>, vector<8x8xbf16>, vector<32x8xf32> -> vector<32x8xf32>
    %21 = arith.addf %17, %20 : vector<32x8xf32>
    %c1 = arith.constant 1 : index
    %c0_19 = arith.constant 0 : index
    %c0_20 = arith.constant 0 : index
    %22 = vector.load %arg5[%c1, %c0_19, %c0_20] : memref<6x8x8xbf16, #tpu.memory_space<vmem>>, vector<1x8x8xbf16>
    %23 = vector.shape_cast %22 : vector<1x8x8xbf16> to vector<8x8xbf16>
    %cst_21 = arith.constant dense<0.000000e+00> : vector<32x8xf32>
    %24 = tpu.matmul %9, %23, %cst_21 {dimension_numbers = #tpu.dot_dimension_numbers<[1], [0], [0], [1], [0, 0, 1, 1], [], []>} : vector<32x8xbf16>, vector<8x8xbf16>, vector<32x8xf32> -> vector<32x8xf32>
    %25 = arith.addf %21, %24 : vector<32x8xf32>
    %26 = vector.extract_strided_slice %16 {offsets = [0, 8], sizes = [32, 8], strides = [1, 1]} : vector<32x16xf32> to vector<32x8xf32>
    %cst_22 = arith.constant 0.000000e+00 : f32
    %27 = vector.broadcast %cst_22 : f32 to vector<32x8xf32>
    %28 = arith.cmpf ogt, %26, %27 : vector<32x8xf32>
    %29 = math.exp %26 : vector<32x8xf32>
    %cst_23 = arith.constant 1.000000e+00 : f32
    %30 = vector.broadcast %cst_23 : f32 to vector<32x8xf32>
    %31 = arith.subf %29, %30 : vector<32x8xf32>
    %32 = arith.select %28, %26, %31 : vector<32x8xi1>, vector<32x8xf32>
    %cst_24 = arith.constant 0.000000e+00 : f32
    %33 = vector.broadcast %cst_24 : f32 to vector<32x8xf32>
    %34 = arith.cmpf ogt, %25, %33 : vector<32x8xf32>
    %35 = math.exp %25 : vector<32x8xf32>
    %cst_25 = arith.constant 1.000000e+00 : f32
    %36 = vector.broadcast %cst_25 : f32 to vector<32x8xf32>
    %37 = arith.subf %35, %36 : vector<32x8xf32>
    %38 = arith.select %34, %25, %37 : vector<32x8xi1>, vector<32x8xf32>
    %39 = arith.truncf %38 : vector<32x8xf32> to vector<32x8xbf16>
    %c0_26 = arith.constant 0 : index
    %c0_27 = arith.constant 0 : index
    %c0_28 = arith.constant 0 : index
    %40 = vector.load %arg6[%c0_26, %c0_27, %c0_28] : memref<3x8x8xbf16, #tpu.memory_space<vmem>>, vector<1x8x8xbf16>
    %41 = vector.shape_cast %40 : vector<1x8x8xbf16> to vector<8x8xbf16>
    %cst_29 = arith.constant dense<0.000000e+00> : vector<32x8xf32>
    %42 = tpu.matmul %39, %41, %cst_29 {dimension_numbers = #tpu.dot_dimension_numbers<[1], [0], [0], [1], [0, 0, 1, 1], [], []>} : vector<32x8xbf16>, vector<8x8xbf16>, vector<32x8xf32> -> vector<32x8xf32>
    %c0_30 = arith.constant 0 : index
    %c0_31 = arith.constant 0 : index
    %c0_32 = arith.constant 0 : index
    %43 = vector.load %arg7[%c0_30, %c0_31, %c0_32] : memref<3x1x8xf32, #tpu.memory_space<vmem>>, vector<1x1x8xf32>
    %44 = vector.shape_cast %43 : vector<1x1x8xf32> to vector<1x8xf32>
    %45 = vector.broadcast %44 : vector<1x8xf32> to vector<32x8xf32>
    %46 = arith.addf %42, %45 : vector<32x8xf32>
    %cst_33 = arith.constant 0.000000e+00 : f32
    %47 = vector.broadcast %cst_33 : f32 to vector<32x8xf32>
    %48 = arith.cmpf ogt, %46, %47 : vector<32x8xf32>
    %49 = math.exp %46 : vector<32x8xf32>
    %cst_34 = arith.constant 1.000000e+00 : f32
    %50 = vector.broadcast %cst_34 : f32 to vector<32x8xf32>
    %51 = arith.subf %49, %50 : vector<32x8xf32>
    %52 = arith.select %48, %46, %51 : vector<32x8xi1>, vector<32x8xf32>
    %53 = arith.addf %32, %52 : vector<32x8xf32>
    %54 = arith.truncf %53 : vector<32x8xf32> to vector<32x8xbf16>
    %c32_35 = arith.constant 32 : index
    %c0_36 = arith.constant 0 : index
    %55 = vector.load %arg10[%c32_35, %c0_36] : memref<48x8xbf16, #tpu.memory_space<vmem>>, vector<16x8xbf16>
    %c0_37 = arith.constant 0 : index
    %c0_38 = arith.constant 0 : index
    %56 = vector.load %arg10[%c0_37, %c0_38] : memref<48x8xbf16, #tpu.memory_space<vmem>>, vector<16x8xbf16>
    tpu.vector_store %arg10[%c0_37, %c0_38], %55 {strides = array<i32>} : memref<48x8xbf16, #tpu.memory_space<vmem>>, vector<16x8xbf16>,
    %c16_39 = arith.constant 16 : index
    %c0_40 = arith.constant 0 : index
    %57 = vector.load %arg10[%c16_39, %c0_40] : memref<48x8xbf16, #tpu.memory_space<vmem>>, vector<32x8xbf16>
    tpu.vector_store %arg10[%c16_39, %c0_40], %54 {strides = array<i32>} : memref<48x8xbf16, #tpu.memory_space<vmem>>, vector<32x8xbf16>,
    %c10 = arith.constant 10 : index
    %c0_41 = arith.constant 0 : index
    %58 = vector.load %arg10[%c10, %c0_41] : memref<48x8xbf16, #tpu.memory_space<vmem>>, vector<32x8xbf16>
    %c13 = arith.constant 13 : index
    %c0_42 = arith.constant 0 : index
    %59 = vector.load %arg10[%c13, %c0_42] : memref<48x8xbf16, #tpu.memory_space<vmem>>, vector<32x8xbf16>
    %c1_43 = arith.constant 1 : index
    %c0_44 = arith.constant 0 : index
    %c0_45 = arith.constant 0 : index
    %60 = vector.load %arg3[%c1_43, %c0_44, %c0_45] : memref<3x8x16xbf16, #tpu.memory_space<vmem>>, vector<1x8x16xbf16>
    %61 = vector.shape_cast %60 : vector<1x8x16xbf16> to vector<8x16xbf16>
    %cst_46 = arith.constant dense<0.000000e+00> : vector<32x16xf32>
    %62 = tpu.matmul %54, %61, %cst_46 {dimension_numbers = #tpu.dot_dimension_numbers<[1], [0], [0], [1], [0, 0, 1, 1], [], []>} : vector<32x8xbf16>, vector<8x16xbf16>, vector<32x16xf32> -> vector<32x16xf32>
    %c1_47 = arith.constant 1 : index
    %c0_48 = arith.constant 0 : index
    %c0_49 = arith.constant 0 : index
    %63 = vector.load %arg4[%c1_47, %c0_48, %c0_49] : memref<3x1x16xf32, #tpu.memory_space<vmem>>, vector<1x1x16xf32>
    %64 = vector.shape_cast %63 : vector<1x1x16xf32> to vector<1x16xf32>
    %65 = vector.broadcast %64 : vector<1x16xf32> to vector<32x16xf32>
    %66 = arith.addf %62, %65 : vector<32x16xf32>
    %67 = vector.extract_strided_slice %66 {offsets = [0, 0], sizes = [32, 8], strides = [1, 1]} : vector<32x16xf32> to vector<32x8xf32>
    %c2 = arith.constant 2 : index
    %c0_50 = arith.constant 0 : index
    %c0_51 = arith.constant 0 : index
    %68 = vector.load %arg5[%c2, %c0_50, %c0_51] : memref<6x8x8xbf16, #tpu.memory_space<vmem>>, vector<1x8x8xbf16>
    %69 = vector.shape_cast %68 : vector<1x8x8xbf16> to vector<8x8xbf16>
    %cst_52 = arith.constant dense<0.000000e+00> : vector<32x8xf32>
    %70 = tpu.matmul %58, %69, %cst_52 {dimension_numbers = #tpu.dot_dimension_numbers<[1], [0], [0], [1], [0, 0, 1, 1], [], []>} : vector<32x8xbf16>, vector<8x8xbf16>, vector<32x8xf32> -> vector<32x8xf32>
    %71 = arith.addf %67, %70 : vector<32x8xf32>
    %c3 = arith.constant 3 : index
    %c0_53 = arith.constant 0 : index
    %c0_54 = arith.constant 0 : index
    %72 = vector.load %arg5[%c3, %c0_53, %c0_54] : memref<6x8x8xbf16, #tpu.memory_space<vmem>>, vector<1x8x8xbf16>
    %73 = vector.shape_cast %72 : vector<1x8x8xbf16> to vector<8x8xbf16>
    %cst_55 = arith.constant dense<0.000000e+00> : vector<32x8xf32>
    %74 = tpu.matmul %59, %73, %cst_55 {dimension_numbers = #tpu.dot_dimension_numbers<[1], [0], [0], [1], [0, 0, 1, 1], [], []>} : vector<32x8xbf16>, vector<8x8xbf16>, vector<32x8xf32> -> vector<32x8xf32>
    %75 = arith.addf %71, %74 : vector<32x8xf32>
    %76 = vector.extract_strided_slice %66 {offsets = [0, 8], sizes = [32, 8], strides = [1, 1]} : vector<32x16xf32> to vector<32x8xf32>
    %cst_56 = arith.constant 0.000000e+00 : f32
    %77 = vector.broadcast %cst_56 : f32 to vector<32x8xf32>
    %78 = arith.cmpf ogt, %76, %77 : vector<32x8xf32>
    %79 = math.exp %76 : vector<32x8xf32>
    %cst_57 = arith.constant 1.000000e+00 : f32
    %80 = vector.broadcast %cst_57 : f32 to vector<32x8xf32>
    %81 = arith.subf %79, %80 : vector<32x8xf32>
    %82 = arith.select %78, %76, %81 : vector<32x8xi1>, vector<32x8xf32>
    %cst_58 = arith.constant 0.000000e+00 : f32
    %83 = vector.broadcast %cst_58 : f32 to vector<32x8xf32>
    %84 = arith.cmpf ogt, %75, %83 : vector<32x8xf32>
    %85 = math.exp %75 : vector<32x8xf32>
    %cst_59 = arith.constant 1.000000e+00 : f32
    %86 = vector.broadcast %cst_59 : f32 to vector<32x8xf32>
    %87 = arith.subf %85, %86 : vector<32x8xf32>
    %88 = arith.select %84, %75, %87 : vector<32x8xi1>, vector<32x8xf32>
    %89 = arith.truncf %88 : vector<32x8xf32> to vector<32x8xbf16>
    %c1_60 = arith.constant 1 : index
    %c0_61 = arith.constant 0 : index
    %c0_62 = arith.constant 0 : index
    %90 = vector.load %arg6[%c1_60, %c0_61, %c0_62] : memref<3x8x8xbf16, #tpu.memory_space<vmem>>, vector<1x8x8xbf16>
    %91 = vector.shape_cast %90 : vector<1x8x8xbf16> to vector<8x8xbf16>
    %cst_63 = arith.constant dense<0.000000e+00> : vector<32x8xf32>
    %92 = tpu.matmul %89, %91, %cst_63 {dimension_numbers = #tpu.dot_dimension_numbers<[1], [0], [0], [1], [0, 0, 1, 1], [], []>} : vector<32x8xbf16>, vector<8x8xbf16>, vector<32x8xf32> -> vector<32x8xf32>
    %c1_64 = arith.constant 1 : index
    %c0_65 = arith.constant 0 : index
    %c0_66 = arith.constant 0 : index
    %93 = vector.load %arg7[%c1_64, %c0_65, %c0_66] : memref<3x1x8xf32, #tpu.memory_space<vmem>>, vector<1x1x8xf32>
    %94 = vector.shape_cast %93 : vector<1x1x8xf32> to vector<1x8xf32>
    %95 = vector.broadcast %94 : vector<1x8xf32> to vector<32x8xf32>
    %96 = arith.addf %92, %95 : vector<32x8xf32>
    %cst_67 = arith.constant 0.000000e+00 : f32
    %97 = vector.broadcast %cst_67 : f32 to vector<32x8xf32>
    %98 = arith.cmpf ogt, %96, %97 : vector<32x8xf32>
    %99 = math.exp %96 : vector<32x8xf32>
    %cst_68 = arith.constant 1.000000e+00 : f32
    %100 = vector.broadcast %cst_68 : f32 to vector<32x8xf32>
    %101 = arith.subf %99, %100 : vector<32x8xf32>
    %102 = arith.select %98, %96, %101 : vector<32x8xi1>, vector<32x8xf32>
    %103 = arith.addf %82, %102 : vector<32x8xf32>
    %104 = arith.truncf %103 : vector<32x8xf32> to vector<32x8xbf16>
    %c32_69 = arith.constant 32 : index
    %c0_70 = arith.constant 0 : index
    %105 = vector.load %arg11[%c32_69, %c0_70] : memref<64x8xbf16, #tpu.memory_space<vmem>>, vector<32x8xbf16>
    %c0_71 = arith.constant 0 : index
    %c0_72 = arith.constant 0 : index
    %106 = vector.load %arg11[%c0_71, %c0_72] : memref<64x8xbf16, #tpu.memory_space<vmem>>, vector<32x8xbf16>
    tpu.vector_store %arg11[%c0_71, %c0_72], %105 {strides = array<i32>} : memref<64x8xbf16, #tpu.memory_space<vmem>>, vector<32x8xbf16>,
    %c32_73 = arith.constant 32 : index
    %c0_74 = arith.constant 0 : index
    %107 = vector.load %arg11[%c32_73, %c0_74] : memref<64x8xbf16, #tpu.memory_space<vmem>>, vector<32x8xbf16>
    tpu.vector_store %arg11[%c32_73, %c0_74], %104 {strides = array<i32>} : memref<64x8xbf16, #tpu.memory_space<vmem>>, vector<32x8xbf16>,
    %c14_75 = arith.constant 14 : index
    %c0_76 = arith.constant 0 : index
    %108 = vector.load %arg11[%c14_75, %c0_76] : memref<64x8xbf16, #tpu.memory_space<vmem>>, vector<32x8xbf16>
    %c23 = arith.constant 23 : index
    %c0_77 = arith.constant 0 : index
    %109 = vector.load %arg11[%c23, %c0_77] : memref<64x8xbf16, #tpu.memory_space<vmem>>, vector<32x8xbf16>
    %c2_78 = arith.constant 2 : index
    %c0_79 = arith.constant 0 : index
    %c0_80 = arith.constant 0 : index
    %110 = vector.load %arg3[%c2_78, %c0_79, %c0_80] : memref<3x8x16xbf16, #tpu.memory_space<vmem>>, vector<1x8x16xbf16>
    %111 = vector.shape_cast %110 : vector<1x8x16xbf16> to vector<8x16xbf16>
    %cst_81 = arith.constant dense<0.000000e+00> : vector<32x16xf32>
    %112 = tpu.matmul %104, %111, %cst_81 {dimension_numbers = #tpu.dot_dimension_numbers<[1], [0], [0], [1], [0, 0, 1, 1], [], []>} : vector<32x8xbf16>, vector<8x16xbf16>, vector<32x16xf32> -> vector<32x16xf32>
    %c2_82 = arith.constant 2 : index
    %c0_83 = arith.constant 0 : index
    %c0_84 = arith.constant 0 : index
    %113 = vector.load %arg4[%c2_82, %c0_83, %c0_84] : memref<3x1x16xf32, #tpu.memory_space<vmem>>, vector<1x1x16xf32>
    %114 = vector.shape_cast %113 : vector<1x1x16xf32> to vector<1x16xf32>
    %115 = vector.broadcast %114 : vector<1x16xf32> to vector<32x16xf32>
    %116 = arith.addf %112, %115 : vector<32x16xf32>
    %117 = vector.extract_strided_slice %116 {offsets = [0, 0], sizes = [32, 8], strides = [1, 1]} : vector<32x16xf32> to vector<32x8xf32>
    %c4 = arith.constant 4 : index
    %c0_85 = arith.constant 0 : index
    %c0_86 = arith.constant 0 : index
    %118 = vector.load %arg5[%c4, %c0_85, %c0_86] : memref<6x8x8xbf16, #tpu.memory_space<vmem>>, vector<1x8x8xbf16>
    %119 = vector.shape_cast %118 : vector<1x8x8xbf16> to vector<8x8xbf16>
    %cst_87 = arith.constant dense<0.000000e+00> : vector<32x8xf32>
    %120 = tpu.matmul %108, %119, %cst_87 {dimension_numbers = #tpu.dot_dimension_numbers<[1], [0], [0], [1], [0, 0, 1, 1], [], []>} : vector<32x8xbf16>, vector<8x8xbf16>, vector<32x8xf32> -> vector<32x8xf32>
    %121 = arith.addf %117, %120 : vector<32x8xf32>
    %c5 = arith.constant 5 : index
    %c0_88 = arith.constant 0 : index
    %c0_89 = arith.constant 0 : index
    %122 = vector.load %arg5[%c5, %c0_88, %c0_89] : memref<6x8x8xbf16, #tpu.memory_space<vmem>>, vector<1x8x8xbf16>
    %123 = vector.shape_cast %122 : vector<1x8x8xbf16> to vector<8x8xbf16>
    %cst_90 = arith.constant dense<0.000000e+00> : vector<32x8xf32>
    %124 = tpu.matmul %109, %123, %cst_90 {dimension_numbers = #tpu.dot_dimension_numbers<[1], [0], [0], [1], [0, 0, 1, 1], [], []>} : vector<32x8xbf16>, vector<8x8xbf16>, vector<32x8xf32> -> vector<32x8xf32>
    %125 = arith.addf %121, %124 : vector<32x8xf32>
    %126 = vector.extract_strided_slice %116 {offsets = [0, 8], sizes = [32, 8], strides = [1, 1]} : vector<32x16xf32> to vector<32x8xf32>
    %cst_91 = arith.constant 0.000000e+00 : f32
    %127 = vector.broadcast %cst_91 : f32 to vector<32x8xf32>
    %128 = arith.cmpf ogt, %126, %127 : vector<32x8xf32>
    %129 = math.exp %126 : vector<32x8xf32>
    %cst_92 = arith.constant 1.000000e+00 : f32
    %130 = vector.broadcast %cst_92 : f32 to vector<32x8xf32>
    %131 = arith.subf %129, %130 : vector<32x8xf32>
    %132 = arith.select %128, %126, %131 : vector<32x8xi1>, vector<32x8xf32>
    %cst_93 = arith.constant 0.000000e+00 : f32
    %133 = vector.broadcast %cst_93 : f32 to vector<32x8xf32>
    %134 = arith.cmpf ogt, %125, %133 : vector<32x8xf32>
    %135 = math.exp %125 : vector<32x8xf32>
    %cst_94 = arith.constant 1.000000e+00 : f32
    %136 = vector.broadcast %cst_94 : f32 to vector<32x8xf32>
    %137 = arith.subf %135, %136 : vector<32x8xf32>
    %138 = arith.select %134, %125, %137 : vector<32x8xi1>, vector<32x8xf32>
    %139 = arith.truncf %138 : vector<32x8xf32> to vector<32x8xbf16>
    %c2_95 = arith.constant 2 : index
    %c0_96 = arith.constant 0 : index
    %c0_97 = arith.constant 0 : index
    %140 = vector.load %arg6[%c2_95, %c0_96, %c0_97] : memref<3x8x8xbf16, #tpu.memory_space<vmem>>, vector<1x8x8xbf16>
    %141 = vector.shape_cast %140 : vector<1x8x8xbf16> to vector<8x8xbf16>
    %cst_98 = arith.constant dense<0.000000e+00> : vector<32x8xf32>
    %142 = tpu.matmul %139, %141, %cst_98 {dimension_numbers = #tpu.dot_dimension_numbers<[1], [0], [0], [1], [0, 0, 1, 1], [], []>} : vector<32x8xbf16>, vector<8x8xbf16>, vector<32x8xf32> -> vector<32x8xf32>
    %c2_99 = arith.constant 2 : index
    %c0_100 = arith.constant 0 : index
    %c0_101 = arith.constant 0 : index
    %143 = vector.load %arg7[%c2_99, %c0_100, %c0_101] : memref<3x1x8xf32, #tpu.memory_space<vmem>>, vector<1x1x8xf32>
    %144 = vector.shape_cast %143 : vector<1x1x8xf32> to vector<1x8xf32>
    %145 = vector.broadcast %144 : vector<1x8xf32> to vector<32x8xf32>
    %146 = arith.addf %142, %145 : vector<32x8xf32>
    %cst_102 = arith.constant 0.000000e+00 : f32
    %147 = vector.broadcast %cst_102 : f32 to vector<32x8xf32>
    %148 = arith.cmpf ogt, %146, %147 : vector<32x8xf32>
    %149 = math.exp %146 : vector<32x8xf32>
    %cst_103 = arith.constant 1.000000e+00 : f32
    %150 = vector.broadcast %cst_103 : f32 to vector<32x8xf32>
    %151 = arith.subf %149, %150 : vector<32x8xf32>
    %152 = arith.select %148, %146, %151 : vector<32x8xi1>, vector<32x8xf32>
    %153 = arith.addf %132, %152 : vector<32x8xf32>
    %c0_104 = arith.constant 0 : index
    %c0_105 = arith.constant 0 : index
    %c0_106 = arith.constant 0 : index
    %154 = vector.load %arg8[%c0_104, %c0_105, %c0_106] : memref<1x32x8xf32, #tpu.memory_space<vmem>>, vector<1x32x8xf32>
    %155 = vector.shape_cast %154 : vector<1x32x8xf32> to vector<32x8xf32>
    %156 = vector.shape_cast %153 : vector<32x8xf32> to vector<1x32x8xf32>
    tpu.vector_store %arg8[%c0_104, %c0_105, %c0_106], %156 {strides = array<i32>} : memref<1x32x8xf32, #tpu.memory_space<vmem>>, vector<1x32x8xf32>,
    return
  }
  func.func @transform_0(%arg0: i32, %arg1: i32) -> (i32, i32, i32) {
    %c0_i32 = arith.constant 0 : i32
    %c0_i32_0 = arith.constant 0 : i32
    return %arg0, %arg1, %c0_i32 : i32, i32, i32
  }
  func.func @transform_1(%arg0: i32, %arg1: i32) -> (i32, i32, i32) {
    %c0_i32 = arith.constant 0 : i32
    %c0_i32_0 = arith.constant 0 : i32
    %c0_i32_1 = arith.constant 0 : i32
    %c0_i32_2 = arith.constant 0 : i32
    return %c0_i32, %c0_i32_0, %c0_i32_1 : i32, i32, i32
  }
  func.func @transform_2(%arg0: i32, %arg1: i32) -> (i32, i32, i32) {
    %c0_i32 = arith.constant 0 : i32
    %c0_i32_0 = arith.constant 0 : i32
    %c0_i32_1 = arith.constant 0 : i32
    %c0_i32_2 = arith.constant 0 : i32
    return %c0_i32, %c0_i32_0, %c0_i32_1 : i32, i32, i32
  }
  func.func @transform_3(%arg0: i32, %arg1: i32) -> (i32, i32, i32) {
    %c0_i32 = arith.constant 0 : i32
    %c0_i32_0 = arith.constant 0 : i32
    %c0_i32_1 = arith.constant 0 : i32
    %c0_i32_2 = arith.constant 0 : i32
    return %c0_i32, %c0_i32_0, %c0_i32_1 : i32, i32, i32
  }
  func.func @transform_4(%arg0: i32, %arg1: i32) -> (i32, i32, i32) {
    %c0_i32 = arith.constant 0 : i32
    %c0_i32_0 = arith.constant 0 : i32
    %c0_i32_1 = arith.constant 0 : i32
    %c0_i32_2 = arith.constant 0 : i32
    return %c0_i32, %c0_i32_0, %c0_i32_1 : i32, i32, i32
  }
  func.func @transform_5(%arg0: i32, %arg1: i32) -> (i32, i32, i32) {
    %c0_i32 = arith.constant 0 : i32
    %c0_i32_0 = arith.constant 0 : i32
    %c0_i32_1 = arith.constant 0 : i32
    %c0_i32_2 = arith.constant 0 : i32
    return %c0_i32, %c0_i32_0, %c0_i32_1 : i32, i32, i32
  }
  func.func @transform_6(%arg0: i32, %arg1: i32) -> (i32, i32, i32) {
    %c0_i32 = arith.constant 0 : i32
    %c0_i32_0 = arith.constant 0 : i32
    return %arg0, %arg1, %c0_i32 : i32, i32, i32
  }
}

</mosaic_0001>

<bundles_post_ra>
// kernel: tile.8
= control target key start
LH: loop header
LB: loop body
LE: loop exit
PB: predicated region body
PF: predicated region fallthrough
CT: control target
= control target key end

     0   :  { %s22_s0 = inlined_call_operand.vmem [shape: f32[8], index: 0, kind: input, shape index: {}]   ;;  %s23_s1 = inlined_call_operand.vmem [shape: f32[2,8], index: 1, kind: output, shape index: {}]  }
   0x1   :  { %v4_v0 = vld [vmem:[%s22_s0] ss:$0 sm:$0xff] }
   0x2   :  { %5 = vst [vmem:[%s23_s1] sm:$0x3] %v4_v0 }

// kernel: tile.9
= control target key start
LH: loop header
LB: loop body
LE: loop exit
PB: predicated region body
PF: predicated region fallthrough
CT: control target
= control target key end

     0   :  { %vm7_vm0 = vcmask 64512   ;;  %vm13_vm1 = vcmask 130112   ;;  %s39_s0 = inlined_call_operand.vmem [shape: f32[2,8], index: 0, kind: input, shape index: {}]   ;;  %s40_s1 = inlined_call_operand.vmem [shape: f32[1,16], index: 1, kind: output, shape index: {}]  }
   0x1   :  { %v4_v0 = vld [vmem:[%s39_s0] sm:$0x3]  ;;  %s22_s0 = smov 8  }
   0x2   :  { %5 = vst [vmem:[#allocation1] sm:$0x3] %v4_v0 }
   0x9   :  { %v10_v1 = vld [vmem:[#allocation1 + $0x1] sm:$0x1]   ;;  %v6_v2 = vld [vmem:[#allocation1] sm:$0x1]  }
   0xa   :  { %11 = vrot.lane.b32.xlu0 %v10_v1, %s22_s0  ;;  %8 = vst.msk [vmem:[#allocation0] sm:$0x1] %vm7_vm0, %v6_v2  }
  0x7c   :  { %v12_v3 = vpop.permute.xlu0 %11  }
  0x7d   :  { %14 = vst.msk [vmem:[#allocation0] sm:$0x1] %vm13_vm1, %v12_v3  }
  0x84   :  { %v18_v4 = vld [vmem:[#allocation0] sm:$0x1] }
  0x85   :  { %20 = vst [vmem:[%s40_s1] sm:$0x1] %v18_v4 }

// kernel: _lambda_.2
= control target key start
LH: loop header
LB: loop body
LE: loop exit
PB: predicated region body
PF: predicated region fallthrough
CT: control target
= control target key end

     0   :  { %s577_s12 = smov 0   ;;  %s579_s13 = smov 0   ;;  %s644_s0 = inlined_call_operand.vmem [shape: bf16[2,32,16], index: 0, kind: input, shape index: {}]   ;;  %s645_s1 = inlined_call_operand.vmem [shape: bf16[32,16], index: 1, kind: input, shape index: {}]   ;;  %s646_s2 = inlined_call_operand.vmem [shape: f32[1,16], index: 2, kind: input, shape index: {}]   ;;  %s647_s3 = inlined_call_operand.vmem [shape: bf16[2,32,16], index: 3, kind: output, shape index: {}]  }
   0x1   :  { %s581_s14 = smov 0   ;;  %s583_s15 = smov 0  }
   0x2   :  { %s585_s16 = smov 0  }
   0x3 LB: > { %s22_s17 = sadd.s32 1, %s543_s14  ;;  %s25_s18 = sadd.s32 1, %s547_s15  ;;  %s551_s16 = sphi %s585_s16, %s13_s16   ;;  %s547_s15 = sphi %s583_s15, %s651_s15   ;;  %s543_s14 = sphi %s581_s14, %s650_s14   ;;  %s539_s13 = sphi %s579_s13, %s649_s13   ;;  %s535_s12 = sphi %s577_s12, %s648_s12  }
   0x4   : > { %p23_p0 = scmp.ge.s32.totalorder %s22_s17, 2  ;;  %p431_p1 = scmp.ge.s32.totalorder %s551_s16, 1 }
   0x5   : > { %p158_p2 = scmp.lt.s32.totalorder %s551_s16, 5 }
   0x6   : > { %s653_s17 = smov (%p23_p0, %s22_s17), 0  ;;  %s655_s18 = smov (!%p23_p0, %s25_s18), %s547_s15 }
   0x7   : > { %p159_p3 = pnand %p431_p1, %p158_p2  ;;  %p27_p4 = scmp.ge.s32.totalorder %s655_s18, 2 }
   0x8   : > { %s432_s19 = sshll.u32 (!%p159_p3), %s535_s12, 1  ;;  %p191_p5 = scmp.lt.s32.totalorder (!%p159_p3), %s539_s13, 1 }
   0x9   : > { %s657_s18 = smov (%p27_p4, %s655_s18), 0  ;;  %162 = sbr.rel (%p159_p3) target bundleno = 392 (0x188), region = 32 }
   0xa   : > { %p193_p6 = scmp.lt.s32.totalorder (!%p159_p3), %s432_s19, 3  ;;  %p438_p7 = scmp.ne.s32.totalorder (!%p159_p3), %s535_s12, 0 }
  0x10   : > { %s659_s13 = smov (!%p191_p5, %s539_s13), 1  ;;  %s661_s19 = smov (!%p193_p6, %s432_s19), 3 }
  0x11   : > { %s433_s20 = sshll.u32 %s659_s13, 2  ;;  %216 = sbr.rel (%p438_p7) target bundleno = 24 (0x18), region = 36  ;;  %vm217_vm0 = vcmask (!%p438_p7), 130048   ;;  %v553_v2 = vmov (!%p438_p7), 0  }
  0x12   : > { %s196_s21 = sadd.s32 %s433_s20, %s661_s19  ;;  %218 = vst.msk [vmem:[#allocation2 + $0x8] sm:$0xff] (!%p438_p7), %vm217_vm0, %v553_v2 }
  0x13   : > { %s434_s22 = sshll.u32 %s196_s21, 2 }
  0x14   : > { %s198_s25 = scalar_lea.vmem %s644_s0, %s434_s22  ;;  %s613_s28 = scalar_lea.vmem %s647_s3, %s434_s22 }
  0x15   : > { %v211_v0 = vld [vmem:[%s198_s25] sm:$0xf]  ;;  %v212_v1 = vld [vmem:[%s198_s25 + $0x4] sm:$0xf] }
  0x18 PF: > { %vm220_vm1 = vcmask 130048   ;;  %v439_v4 = vcombine.low %v211_v0, %v212_v1  ;;  %v554_v5 = vmov 0.0   ;;  %v507_v6 = vld [vmem:[%s645_s1] sm:$0xff]   ;;  %v508_v7 = vld [vmem:[%s645_s1 + $0x8] sm:$0xff]   ;;  %vm555_vm2 = vmmov 0   ;;  %s556_s6 = smov 16  }
  0x19   : > { %v219_v3 = vld [vmem:[#allocation2 + $0x8] sm:$0xff]  ;;  %455 = vmatprep.subr.bf16.mxu0 %v554_v5  ;;  %459 = vmatprep.mubr.msk.bf16.mxu0 %vm555_vm2, %v554_v5  ;;  %vm231_vm3 = vsmask.f32 256  ;;  %vm272_vm4 = vcmask 261120   ;;  %v440_v19 = vld [vmem:[%s646_s2] ss:$0 sm:$0xff] }
  0x1a   : > { %221 = vst.msk [vmem:[#allocation2] sm:$0xff] %vm220_vm1, %v219_v3  ;;  %228 = vst.msk [vmem:[#allocation2 + $0x8] sm:$0xff] %vm220_vm1, %v439_v4  ;;  %456 = vmatpush3.bf16.msra.mxu0 %v507_v6  ;;  %vm334_vm6 = vcmask 125952  }
  0x1b   : > { %457 = vmatprep.subr.bf16.mxu0 %v554_v5 }
  0x1e   : > { %458 = vmatpush3.bf16.msra.mxu0 %v508_v7 }
  0x21   : > { %v229_v8 = vld [vmem:[#allocation2] sm:$0x80]  ;;  %v230_v9 = vld [vmem:[#allocation2 + $0x8] sm:$0xff] }
  0x22   : > { %v233_v10 = vshrl.u32 %v229_v8, 16  ;;  %v237_v11 = vshrl.u32 %v230_v9, 16  ;;  %v240_v12 = vshll.u32 %v230_v9, 16 }
  0x24   : > { %v235_v13 = vrot.slane %v233_v10, 7  ;;  %v239_v14 = vrot.slane %v237_v11, 7 }
  0x26   : > { %v242_v15 = vor.u32 %v240_v12, %v239_v14 }
  0x28   : > { %v243_v16 = vsel %vm231_vm3, %v235_v13, %v242_v15 }
  0x29   : > { %244 = vrot.lane.b32.xlu0 %v243_v16, %s556_s6 }
  0x9b   : > { %v245_v17 = vpop.permute.xlu0 %244 }
  0x9c   : > { %v248_v18 = vsel %vm220_vm1, %v439_v4, %v245_v17 }
  0x9d   : > { %460 = vmatmul.mubr.msk.bf16.vlgmr.msra.gmra.mrb[0].mxu0 %vm272_vm4, %v248_v18 }
 0x170   : > { %v309_v20 = vpop.f32.mrb[0].mxu0 }
 0x171   : > { %v310_v21 = vadd.f32 %v440_v19, %v309_v20  ;;  %v461_v22 = vpop.f32.mrb[1].mxu0 }
 0x172   : > { %v312_v23 = vpop.f32.mrb[2].mxu0 }
 0x173   : > { %v318_v24 = vmul.f32 1.442695, %v310_v21  ;;  %v313_v25 = vadd.f32 %v440_v19, %v312_v23  ;;  %v462_v26 = vpop.f32.mrb[3].mxu0  ;;  %vm316_vm5 = vcmp.gt.f32.partialorder %v310_v21, 0.0 }
 0x175   : > { %509 = vpow2.f32 %v318_v24  ;;  %v320_v27 = vmul.f32 1.442695, %v313_v25  ;;  %vm317_vm7 = vcmp.gt.f32.partialorder %v313_v25, 0.0 }
 0x177   : > { %511 = vpow2.f32 %v320_v27 }
 0x17f   : > { %v510_v28 = vpop.eup %509 }
 0x180   : > { %v444_v29 = vadd.f32 -1.0, %v510_v28 }
 0x181   : > { %v512_v30 = vpop.eup %511 }
 0x182   : > { %v324_v31 = vsel %vm316_vm5, %v310_v21, %v444_v29  ;;  %v445_v32 = vadd.f32 -1.0, %v512_v30 }
 0x183   : > { %v450_v33 = vpack.c.bf16 %v324_v31, %v324_v31 }
 0x184   : > { %v325_v34 = vsel %vm317_vm7, %v313_v25, %v445_v32 }
 0x185   : > { %335 = vst.msk [vmem:[%s613_s28] sm:$0xf] %vm334_vm6, %v450_v33  ;;  %v451_v35 = vpack.c.bf16 %v325_v34, %v325_v34 }
 0x187   : > { %336 = vst.msk [vmem:[%s613_s28 + $0x4] sm:$0xf] %vm334_vm6, %v451_v35 }
 0x188 PF: > { %s13_s16 = sadd.s32 1, %s551_s16   ;;  %s648_s12 = smov %s543_s14 }
 0x189   : > { %p10_p8 = scmp.ge.s32.totalorder %s13_s16, 6   ;;  %s649_s13 = smov %s547_s15 }
 0x18a   : > { %s650_s14 = smov %s653_s17  ;;  %s651_s15 = smov %s657_s18 }
 0x18b   :  { %12 = sbr.rel (!%p10_p8) target bundleno = 3 (0x3), region = 66 }

// kernel: _lambda_.3
= control target key start
LH: loop header
LB: loop body
LE: loop exit
PB: predicated region body
PF: predicated region fallthrough
CT: control target
= control target key end

     0   :  { %s2044_s21 = smov 0   ;;  %s2046_s22 = smov 0   ;;  %s2317_s0 = inlined_call_operand.vmem [shape: bf16[2,64,8], index: 0, kind: input, shape index: {}]   ;;  %s2318_s1 = inlined_call_operand.vmem [shape: bf16[3,8,16], index: 1, kind: input, shape index: {}]   ;;  %s2319_s2 = inlined_call_operand.vmem [shape: f32[3,1,16], index: 2, kind: input, shape index: {}]   ;;  %s2320_s3 = inlined_call_operand.vmem [shape: bf16[6,8,8], index: 3, kind: input, shape index: {}]   ;;  %s2321_s4 = inlined_call_operand.vmem [shape: bf16[3,8,8], index: 4, kind: input, shape index: {}]   ;;  %s2322_s5 = inlined_call_operand.vmem [shape: f32[3,1,8], index: 5, kind: input, shape index: {}]   ;;  %s2323_s6 = inlined_call_operand.vmem [shape: f32[2,64,8], index: 6, kind: output, shape index: {}]  }
   0x1   :  { %s2048_s23 = smov 0   ;;  %s2050_s24 = smov 0  }
   0x2   :  { %s2052_s25 = smov 0  }
   0x3 LB: > { %s25_s26 = sadd.s32 1, %s1996_s23  ;;  %s28_s27 = sadd.s32 1, %s2000_s24  ;;  %s2004_s25 = sphi %s2052_s25, %s16_s25   ;;  %s2000_s24 = sphi %s2050_s24, %s2327_s24   ;;  %s1996_s23 = sphi %s2048_s23, %s2326_s23   ;;  %s1992_s22 = sphi %s2046_s22, %s2325_s22   ;;  %s1988_s21 = sphi %s2044_s21, %s2324_s21  }
   0x4   : > { %p26_p0 = scmp.ge.s32.totalorder %s25_s26, 2  ;;  %p1616_p1 = scmp.ge.s32.totalorder %s2004_s25, 1 }
   0x5   : > { %p233_p2 = scmp.lt.s32.totalorder %s2004_s25, 5 }
   0x6   : > { %s2329_s26 = smov (%p26_p0, %s25_s26), 0  ;;  %s2331_s27 = smov (!%p26_p0, %s28_s27), %s2000_s24 }
   0x7   : > { %p234_p3 = pnand %p1616_p1, %p233_p2  ;;  %p30_p4 = scmp.ge.s32.totalorder %s2331_s27, 2 }
   0x8   : > { %s1617_s28 = sshll.u32 (!%p234_p3), %s1988_s21, 2  ;;  %p272_p5 = scmp.lt.s32.totalorder (!%p234_p3), %s1992_s22, 1 }
   0x9   : > { %s2333_s27 = smov (%p30_p4, %s2331_s27), 0  ;;  %237 = sbr.rel (%p234_p3) target bundleno = 2211 (0x8a3), region = 44 }
   0xa   : > { %p274_p6 = scmp.lt.s32.totalorder (!%p234_p3), %s1617_s28, 7  ;;  %p1623_p7 = scmp.ne.s32.totalorder (!%p234_p3), %s1988_s21, 0 }
  0x10   : > { %s2335_s22 = smov (!%p272_p5, %s1992_s22), 1  ;;  %s2337_s28 = smov (!%p274_p6, %s1617_s28), 7 }
  0x11   : > { %s1618_s29 = sshll.u32 %s2335_s22, 3  ;;  %299 = sbr.rel (%p1623_p7) target bundleno = 24 (0x18), region = 48  ;;  %vm300_vm0 = vcmask (!%p1623_p7), 64512   ;;  %v2006_v4 = vmov (!%p1623_p7), 0  }
  0x12   : > { %s277_s30 = sadd.s32 %s1618_s29, %s2337_s28  ;;  %301 = vst.msk [vmem:[#allocation2 + $0x10] sm:$0xff] (!%p1623_p7), %vm300_vm0, %v2006_v4  ;;  %302 = vst.msk [vmem:[#allocation3 + $0x10] sm:$0xff] (!%p1623_p7), %vm300_vm0, %v2006_v4 }
  0x13   : > { %s1619_s7 = sshll.u32 %s277_s30, 2  ;;  %s1622_s8 = sshll.u32 %s277_s30, 3  ;;  %303 = vst.msk [vmem:[#allocation4 + $0x10] sm:$0xff] (!%p1623_p7), %vm300_vm0, %v2006_v4  ;;  %304 = vst.msk [vmem:[#allocation4 + $0x18] sm:$0xff] (!%p1623_p7), %vm300_vm0, %v2006_v4 }
  0x14   : > { %s279_s11 = scalar_lea.vmem %s2317_s0, %s1619_s7  ;;  %s2083_s14 = scalar_lea.vmem %s2323_s6, %s1622_s8 }
  0x15   : > { %v292_v0 = vld [vmem:[%s279_s11] sm:$0xf]  ;;  %v293_v1 = vld [vmem:[%s279_s11 + $0x4] sm:$0xf]  ;;  %v294_v2 = vld [vmem:[%s279_s11 + $0x8] sm:$0xf] }
  0x16   : > { %v295_v3 = vld [vmem:[%s279_s11 + $0xc] sm:$0xf] }
  0x18 PF: > { %v326_v5 = vld [vmem:[%s2318_s1] sm:$0xf]  ;;  %vm340_vm1 = vcmask 1043456   ;;  %vm306_vm2 = vcmask 64512   ;;  %v1624_v6 = vcombine.low %v292_v0, %v293_v1  ;;  %v1625_v8 = vcombine.low %v294_v2, %v295_v3  ;;  %v1631_v12 = vld [vmem:[%s2320_s3 + $0x4] sm:$0xf] }
  0x19   : > { %v305_v7 = vld [vmem:[#allocation2 + $0x10] sm:$0xff]  ;;  %1839 = vmatprep.subr.msk.bf16.mxu0 %vm340_vm1, %v326_v5  ;;  %v342_v9 = vsel %vm340_vm1, %v326_v5, 0  ;;  %v393_v10 = vld [vmem:[%s2320_s3] sm:$0xf]  ;;  %vm397_vm3 = vcmask 1040384   ;;  %v495_v23 = vsel %vm340_vm1, %v1631_v12, 0 }
  0x1a   : > { %307 = vst.msk [vmem:[#allocation2] sm:$0xff] %vm306_vm2, %v305_v7  ;;  %1744 = vmatpush3.bf16.msra.mxu0 %v342_v9  ;;  %320 = vst.msk [vmem:[#allocation2 + $0x8] sm:$0xff] %vm306_vm2, %v1624_v6  ;;  %1745 = vmatprep.mubr.msk.bf16.mxu0 %vm306_vm2, %v1624_v6  ;;  %v410_v11 = vsel %vm340_vm1, %v393_v10, 0  ;;  %vm467_vm4 = vsmask.f32 256  ;;  %s2007_s10 = smov 8  }
  0x1b   : > { %321 = vst.msk [vmem:[#allocation2 + $0x10] sm:$0xff] %vm306_vm2, %v1625_v8  ;;  %1840 = vmatprep.subr.msk.bf16.mxu1 %vm340_vm1, %v393_v10  ;;  %v592_v35 = vld [vmem:[%s2321_s4] sm:$0xf]  ;;  %s2008_s16 = smov 120  }
  0x1c   : > { %1750 = vmatpush3.bf16.msra.mxu1 %v410_v11  ;;  %1842 = vmatprep.subr.msk.bf16.mxu0 %vm340_vm1, %v592_v35  ;;  %v607_v36 = vsel %vm340_vm1, %v592_v35, 0  ;;  %v1626_v41 = vld [vmem:[%s2319_s2] ss:$0 sm:$0xff] }
  0x1d   : > { %1746 = vmatmul.mubr.msk.bf16.vlgmr.msra.gmra.mrb[0].mxu0 %vm306_vm2, %v1625_v8  ;;  %1841 = vmatprep.subr.msk.bf16.mxu1 %vm340_vm1, %v1631_v12  ;;  %v1642_v8 = vld [vmem:[%s2322_s5] ss:$0 sm:$0xff] }
  0x1e   : > { %1762 = vmatpush3.bf16.msra.mxu0 %v607_v36 }
  0x21   : > { %v322_v13 = vld [vmem:[#allocation2] sm:$0x80]  ;;  %v323_v14 = vld [vmem:[#allocation2 + $0x8] sm:$0xff] }
  0x22   : > { %v398_v15 = vrot.slane %v322_v13, 7  ;;  %v469_v16 = vshrl.u32 %v322_v13, 16  ;;  %v324_v17 = vld [vmem:[#allocation2 + $0x10] sm:$0x7f]  ;;  %v399_v19 = vrot.slane %v323_v14, 7  ;;  %v473_v20 = vshrl.u32 %v323_v14, 16 }
  0x23   : > { %v325_v18 = vld [vmem:[#allocation2 + $0x10] sm:$0xff]  ;;  %v476_v21 = vshll.u32 %v323_v14, 16  ;;  %v401_v22 = vrot.slane %v324_v17, 7 }
  0x24   : > { %v481_v24 = vshrl.u32 %v325_v18, 16  ;;  %v400_v25 = vsel %vm397_vm3, %v398_v15, %v399_v19  ;;  %v471_v26 = vrot.slane %v469_v16, 7  ;;  %v475_v28 = vrot.slane %v473_v20, 7 }
  0x25   : > { %v402_v27 = vsel %vm397_vm3, %v399_v19, %v401_v22  ;;  %1751 = vmatprep.mubr.msk.bf16.mxu1 %vm306_vm2, %v400_v25  ;;  %v484_v31 = vshll.u32 %v325_v18, 16  ;;  %v1649_v22 = vld [vmem:[%s2318_s1 + $0x4] sm:$0xf] }
  0x26   : > { %1752 = vmatmul.mubr.msk.bf16.vlgmr.msra.gmra.mrb[0].mxu1 %vm306_vm2, %v402_v27  ;;  %v478_v29 = vor.u32 %v476_v21, %v475_v28  ;;  %v483_v30 = vrot.slane %v481_v24, 7  ;;  %1843 = vmatprep.subr.msk.bf16.mxu0 %vm340_vm1, %v1649_v22 }
  0x27   : > { %1756 = vmatpush3.bf16.msra.mxu1 %v495_v23  ;;  %v700_v23 = vld [vmem:[#allocation3 + $0x10] sm:$0xff] }
  0x28   : > { %v479_v32 = vsel %vm467_vm4, %v471_v26, %v478_v29  ;;  %v486_v33 = vor.u32 %v484_v31, %v483_v30  ;;  %v734_v26 = vsel %vm340_vm1, %v1649_v22, 0  ;;  %701 = vst.msk [vmem:[#allocation3] sm:$0xff] %vm306_vm2, %v700_v23 }
  0x29   : > { %1757 = vmatprep.mubr.msk.bf16.mxu1 %vm306_vm2, %v479_v32 }
  0x2a   : > { %v487_v34 = vsel %vm467_vm4, %v475_v28, %v486_v33  ;;  %vm790_vm4 = vcmask 1042432  }
  0x32   : > { %1758 = vmatmul.mubr.msk.bf16.vlgmr.msra.gmra.mrb[0].mxu1 %vm306_vm2, %v487_v34 }
  0xf0   : > { %v1747_v37 = vpop.f32.mrb[0].mxu0 }
  0xf1   : > { %v378_v38 = vpop.f32.mrb[1].mxu0  ;;  %v2120_v42 = vadd.f32 %v1747_v37, %v1626_v41 }
  0xf2   : > { %v1748_v39 = vpop.f32.mrb[2].mxu0  ;;  %v2122_v43 = vadd.f32 %v1626_v41, %v378_v38 }
  0xf3   : > { %v381_v40 = vpop.f32.mrb[3].mxu0  ;;  %v2124_v45 = vadd.f32 %v1748_v39, %v1626_v41  ;;  %v558_v36 = vmul.f32 1.442695, %v2120_v42  ;;  %vm552_vm13 = vcmp.gt.f32.partialorder %v2120_v42, 0.0 }
  0xf4   : > { %v2127_v48 = vadd.f32 %v1626_v41, %v381_v40  ;;  %v554_v37 = vmul.f32 1.442695, %v2122_v43  ;;  %vm550_vm15 = vcmp.gt.f32.partialorder %v2122_v43, 0.0 }
  0xf5   : > { %v560_v38 = vmul.f32 1.442695, %v2124_v45  ;;  %vm553_vm14 = vcmp.gt.f32.partialorder %v2124_v45, 0.0 }
  0xf6   : > { %v556_v39 = vmul.f32 1.442695, %v2127_v48  ;;  %vm551_vm0 = vcmp.gt.f32.partialorder %v2127_v48, 0.0 }
 0x105   : > { %v1759_v44 = vpop.f32.mrb[0].mxu1 }
 0x106   : > { %v1815_v46 = vadd.f32 %v1759_v44, %v2120_v42  ;;  %v531_v47 = vpop.f32.mrb[1].mxu1 }
 0x107   : > { %v1816_v49 = vadd.f32 %v531_v47, %v2122_v43  ;;  %v1760_v50 = vpop.f32.mrb[2].mxu1  ;;  %v1654_v47 = vld [vmem:[%s2320_s3 + $0x8] sm:$0xf] }
 0x108   : > { %v578_v51 = vmul.f32 1.442695, %v1815_v46  ;;  %v1817_v52 = vadd.f32 %v1760_v50, %v2124_v45  ;;  %v534_v53 = vpop.f32.mrb[3].mxu1  ;;  %vm572_vm5 = vcmp.gt.f32.partialorder %v1815_v46, 0.0  ;;  %1844 = vmatprep.subr.msk.bf16.mxu1 %vm340_vm1, %v1654_v47 }
 0x109   : > { %v574_v54 = vmul.f32 1.442695, %v1816_v49  ;;  %v1818_v55 = vadd.f32 %v534_v53, %v2127_v48  ;;  %vm570_vm7 = vcmp.gt.f32.partialorder %v1816_v49, 0.0 }
 0x10a   : > { %1894 = vpow2.f32 %v578_v51  ;;  %v580_v56 = vmul.f32 1.442695, %v1817_v52  ;;  %vm573_vm6 = vcmp.gt.f32.partialorder %v1817_v52, 0.0 }
 0x10b   : > { %1896 = vpow2.f32 %v574_v54  ;;  %v576_v57 = vmul.f32 1.442695, %v1818_v55  ;;  %vm571_vm8 = vcmp.gt.f32.partialorder %v1818_v55, 0.0 }
 0x10c   : > { %1898 = vpow2.f32 %v580_v56 }
 0x10d   : > { %1900 = vpow2.f32 %v576_v57 }
 0x114   : > { %v1895_v58 = vpop.eup %1894 }
 0x115   : > { %v1897_v59 = vpop.eup %1896  ;;  %v1640_v60 = vadd.f32 -1.0, %v1895_v58 }
 0x116   : > { %v1899_v61 = vpop.eup %1898  ;;  %v1638_v62 = vadd.f32 -1.0, %v1897_v59 }
 0x117   : > { %v1901_v63 = vpop.eup %1900  ;;  %v1641_v0 = vadd.f32 -1.0, %v1899_v61  ;;  %v588_v2 = vsel %vm572_vm5, %v1815_v46, %v1640_v60  ;;  %vm860_vm5 = vsmask.f32 1280 }
 0x118   : > { %v1639_v1 = vadd.f32 -1.0, %v1901_v63  ;;  %v586_v4 = vsel %vm570_vm7, %v1816_v49, %v1638_v62  ;;  %v803_v49 = vsel %vm340_vm1, %v1654_v47, 0 }
 0x119   : > { %v589_v3 = vsel %vm573_vm6, %v1817_v52, %v1641_v0  ;;  %1774 = vmatpush3.bf16.msra.mxu1 %v803_v49 }
 0x11a   : > { %v591_v5 = vpack.c.bf16 %v589_v3, %v588_v2  ;;  %v587_v6 = vsel %vm571_vm8, %v1818_v55, %v1639_v1 }
 0x11b   : > { %v590_v7 = vpack.c.bf16 %v587_v6, %v586_v4  ;;  %v1657_v4 = vld [vmem:[%s2320_s3 + $0xc] sm:$0xf]  ;;  %v712_v6 = vld [vmem:[#allocation3] sm:$0xe0] }
 0x11c   : > { %1845 = vmatprep.subr.msk.bf16.mxu1 %vm340_vm1, %v1657_v4 }
 0x11d   : > { %1763 = vmatprep.mubr.msk.bf16.mxu0 %vm306_vm2, %v590_v7 }
 0x11e   : > { %1764 = vmatmul.mubr.msk.bf16.vlgmr.msra.gmra.mrb[4].mxu0 %vm306_vm2, %v591_v5 }
 0x11f   : > { %1768 = vmatpush3.bf16.msra.mxu0 %v734_v26 }
 0x1f1   : > { %v1765_v9 = vpop.f32.mrb[4].mxu0 }
 0x1f2   : > { %v652_v10 = vadd.f32 %v1765_v9, %v1642_v8  ;;  %v643_v11 = vpop.f32.mrb[5].mxu0  ;;  %v791_v9 = vrot.slane %v712_v6, 5 }
 0x1f3   : > { %v644_v12 = vadd.f32 %v1642_v8, %v643_v11  ;;  %v1766_v13 = vpop.f32.mrb[6].mxu0 }
 0x1f4   : > { %v666_v14 = vmul.f32 1.442695, %v652_v10  ;;  %v655_v15 = vadd.f32 %v1766_v13, %v1642_v8  ;;  %v646_v16 = vpop.f32.mrb[7].mxu0  ;;  %vm660_vm9 = vcmp.gt.f32.partialorder %v652_v10, 0.0 }
 0x1f5   : > { %v662_v17 = vmul.f32 1.442695, %v644_v12  ;;  %v647_v18 = vadd.f32 %v1642_v8, %v646_v16  ;;  %vm658_vm10 = vcmp.gt.f32.partialorder %v644_v12, 0.0 }
 0x1f6   : > { %1902 = vpow2.f32 %v666_v14  ;;  %v668_v19 = vmul.f32 1.442695, %v655_v15  ;;  %vm661_vm11 = vcmp.gt.f32.partialorder %v655_v15, 0.0 }
 0x1f7   : > { %1904 = vpow2.f32 %v662_v17  ;;  %v664_v20 = vmul.f32 1.442695, %v647_v18  ;;  %vm659_vm12 = vcmp.gt.f32.partialorder %v647_v18, 0.0  ;;  %v894_v17 = vsel %vm340_vm1, %v1657_v4, 0 }
 0x1f8   : > { %1906 = vpow2.f32 %v668_v19 }
 0x1f9   : > { %1908 = vpow2.f32 %v664_v20 }
 0x1fa   : > { %1910 = vpow2.f32 %v558_v36 }
 0x1fb   : > { %1912 = vpow2.f32 %v554_v37  ;;  %v1651_v37 = vld [vmem:[%s2319_s2 + $0x1] ss:$0 sm:$0xff] }
 0x1fc   : > { %1914 = vpow2.f32 %v560_v38 }
 0x1fd   : > { %1916 = vpow2.f32 %v556_v39 }
 0x200   : > { %v1903_v21 = vpop.eup %1902 }
 0x201   : > { %v1905_v24 = vpop.eup %1904  ;;  %v1647_v25 = vadd.f32 -1.0, %v1903_v21 }
 0x202   : > { %v1907_v27 = vpop.eup %1906  ;;  %v1645_v28 = vadd.f32 -1.0, %v1905_v24 }
 0x203   : > { %v1909_v29 = vpop.eup %1908  ;;  %v676_v30 = vsel %vm660_vm9, %v652_v10, %v1647_v25  ;;  %v1648_v31 = vadd.f32 -1.0, %v1907_v27 }
 0x204   : > { %686 = vrot.lane.b32.xlu1 %v676_v30, %s2007_s10  ;;  %v674_v32 = vsel %vm658_vm10, %v644_v12, %v1645_v28  ;;  %v1646_v33 = vadd.f32 -1.0, %v1909_v29  ;;  %v1911_v40 = vpop.eup %1910 }
 0x205   : > { %682 = vrot.lane.b32.xlu0 %v674_v32, %s2007_s10  ;;  %v677_v34 = vsel %vm661_vm11, %v655_v15, %v1648_v31  ;;  %v1913_v41 = vpop.eup %1912  ;;  %v1636_v50 = vadd.f32 -1.0, %v1911_v40  ;;  %v1668_v31 = vld [vmem:[%s2321_s4 + $0x4] sm:$0xf] }
 0x206   : > { %v675_v35 = vsel %vm659_vm12, %v647_v18, %v1646_v33  ;;  %v1915_v44 = vpop.eup %1914  ;;  %v1634_v53 = vadd.f32 -1.0, %v1913_v41  ;;  %1846 = vmatprep.subr.msk.bf16.mxu0 %vm340_vm1, %v1668_v31  ;;  %v1008_v32 = vsel %vm340_vm1, %v1668_v31, 0 }
 0x207   : > { %v1917_v46 = vpop.eup %1916  ;;  %v1637_v52 = vadd.f32 -1.0, %v1915_v44  ;;  %v568_v56 = vsel %vm552_vm13, %v2120_v42, %v1636_v50 }
 0x208   : > { %688 = vrot.lane.b32.xlu1 %v677_v34, %s2007_s10  ;;  %v1635_v55 = vadd.f32 -1.0, %v1917_v46  ;;  %v566_v60 = vsel %vm550_vm15, %v2122_v43, %v1634_v53  ;;  %v715_v43 = vld [vmem:[#allocation3] sm:$0xc0] }
 0x209   : > { %684 = vrot.lane.b32.xlu0 %v675_v35, %s2007_s10  ;;  %v569_v57 = vsel %vm553_vm14, %v2124_v45, %v1637_v52  ;;  %v865_v5 = vshll.u32 %v715_v43, 16 }
 0x20a   : > { %v567_v62 = vsel %vm551_vm0, %v2127_v48, %v1635_v55  ;;  %v862_v48 = vshrl.u32 %v715_v43, 16 }
 0x20b   : > { %v867_v8 = vrot.slane %v865_v5, 7 }
 0x20c   : > { %v864_v7 = vrot.slane %v862_v48, 6  ;;  %v1670_v48 = vld [vmem:[%s2322_s5 + $0x1] ss:$0 sm:$0xff] }
 0x20e   : > { %v868_v18 = vor.u32 %v867_v8, %v864_v7 }
 0x276   : > { %v687_v51 = vpop.permute.xlu1 %686 }
 0x277   : > { %v683_v54 = vpop.permute.xlu0 %682  ;;  %v696_v59 = vadd.f32 %v687_v51, %v568_v56 }
 0x278   : > { %v694_v0 = vadd.f32 %v683_v54, %v566_v60 }
 0x27a   : > { %v689_v58 = vpop.permute.xlu1 %688 }
 0x27b   : > { %v697_v61 = vadd.f32 %v689_v58, %v569_v57  ;;  %v685_v63 = vpop.permute.xlu0 %684 }
 0x27c   : > { %v695_v1 = vadd.f32 %v685_v63, %v567_v62 }
 0x27d   : > { %v699_v2 = vpack.c.bf16 %v697_v61, %v696_v59 }
 0x27e   : > { %v698_v3 = vpack.c.bf16 %v695_v1, %v694_v0 }
 0x27f   : > { %706 = vrot.lane.b32.xlu1 %v699_v2, %s2008_s16 }
 0x280   : > { %704 = vrot.lane.b32.xlu0 %v698_v3, %s2008_s16 }
 0x2f1   : > { %v707_v42 = vpop.permute.xlu1 %706 }
 0x2f2   : > { %711 = vst.msk [vmem:[#allocation3 + $0x10] sm:$0xff] %vm306_vm2, %v707_v42  ;;  %v705_v45 = vpop.permute.xlu0 %704 }
 0x2f3   : > { %710 = vst.msk [vmem:[#allocation3 + $0x8] sm:$0xff] %vm306_vm2, %v705_v45  ;;  %1769 = vmatprep.mubr.msk.bf16.mxu0 %vm306_vm2, %v705_v45 }
 0x2f4   : > { %1770 = vmatmul.mubr.msk.bf16.vlgmr.msra.gmra.mrb[8].mxu0 %vm306_vm2, %v707_v42 }
 0x2f5   : > { %1786 = vmatpush3.bf16.msra.mxu0 %v1008_v32 }
 0x2f9   : > { %v714_v10 = vld [vmem:[#allocation3 + $0x10] sm:$0x1f] }
 0x2fa   : > { %v713_v11 = vld [vmem:[#allocation3 + $0x8] sm:$0xff]  ;;  %v794_v12 = vrot.slane %v714_v10, 5  ;;  %v716_v16 = vld [vmem:[#allocation3 + $0x10] sm:$0x7f] }
 0x2fb   : > { %v792_v13 = vrot.slane %v713_v11, 5  ;;  %v870_v14 = vshrl.u32 %v713_v11, 16  ;;  %v873_v15 = vshll.u32 %v713_v11, 16  ;;  %v879_v23 = vshrl.u32 %v716_v16, 16 }
 0x2fc   : > { %v882_v24 = vshll.u32 %v716_v16, 16 }
 0x2fd   : > { %v793_v19 = vsel %vm790_vm4, %v791_v9, %v792_v13  ;;  %v795_v20 = vsel %vm790_vm4, %v792_v13, %v794_v12  ;;  %v872_v21 = vrot.slane %v870_v14, 6  ;;  %v875_v22 = vrot.slane %v873_v15, 7 }
 0x2fe   : > { %1775 = vmatprep.mubr.msk.bf16.mxu1 %vm306_vm2, %v793_v19  ;;  %v881_v27 = vrot.slane %v879_v23, 6  ;;  %v884_v28 = vrot.slane %v882_v24, 7 }
 0x2ff   : > { %1776 = vmatmul.mubr.msk.bf16.vlgmr.msra.gmra.mrb[4].mxu1 %vm306_vm2, %v795_v20  ;;  %v876_v25 = vor.u32 %v875_v22, %v872_v21  ;;  %v1101_v21 = vld [vmem:[#allocation4 + $0x10] sm:$0xff] }
 0x300   : > { %1780 = vmatpush3.bf16.msra.mxu1 %v894_v17  ;;  %v885_v29 = vor.u32 %v884_v28, %v881_v27  ;;  %1103 = vst.msk [vmem:[#allocation4] sm:$0xff] %vm306_vm2, %v1101_v21 }
 0x301   : > { %v877_v26 = vsel %vm860_vm5, %v868_v18, %v876_v25 }
 0x302   : > { %1781 = vmatprep.mubr.msk.bf16.mxu1 %vm306_vm2, %v877_v26  ;;  %v886_v30 = vsel %vm860_vm5, %v876_v25, %v885_v29  ;;  %vm1263_vm5 = vsmask.f32 4352 }
 0x30b   : > { %1782 = vmatmul.mubr.msk.bf16.vlgmr.msra.gmra.mrb[4].mxu1 %vm306_vm2, %v886_v30 }
 0x3c7   : > { %v1771_v33 = vpop.f32.mrb[8].mxu0 }
 0x3c8   : > { %v770_v34 = vpop.f32.mrb[9].mxu0  ;;  %v2187_v38 = vadd.f32 %v1771_v33, %v1651_v37 }
 0x3c9   : > { %v1772_v35 = vpop.f32.mrb[10].mxu0  ;;  %v2189_v39 = vadd.f32 %v1651_v37, %v770_v34  ;;  %v1102_v34 = vld [vmem:[#allocation4 + $0x18] sm:$0xff] }
 0x3ca   : > { %v773_v36 = vpop.f32.mrb[11].mxu0  ;;  %v2191_v41 = vadd.f32 %v1772_v35, %v1651_v37  ;;  %v957_v32 = vmul.f32 1.442695, %v2187_v38  ;;  %v1677_v35 = vld [vmem:[%s2318_s1 + $0x8] sm:$0xf]  ;;  %1104 = vst.msk [vmem:[#allocation4 + $0x8] sm:$0xff] %vm306_vm2, %v1102_v34 }
 0x3cb   : > { %v2194_v47 = vadd.f32 %v1651_v37, %v773_v36  ;;  %v953_v30 = vmul.f32 1.442695, %v2189_v39  ;;  %1847 = vmatprep.subr.msk.bf16.mxu0 %vm340_vm1, %v1677_v35  ;;  %v1138_v37 = vsel %vm340_vm1, %v1677_v35, 0  ;;  %vm949_vm14 = vcmp.gt.f32.partialorder %v2189_v39, 0.0  ;;  %v1679_v35 = vld [vmem:[%s2319_s2 + $0x2] ss:$0 sm:$0xff] }
 0x3cc   : > { %v959_v33 = vmul.f32 1.442695, %v2191_v41  ;;  %vm951_vm0 = vcmp.gt.f32.partialorder %v2187_v38, 0.0  ;;  %vm952_vm4 = vcmp.gt.f32.partialorder %v2191_v41, 0.0 }
 0x3cd   : > { %v955_v31 = vmul.f32 1.442695, %v2194_v47  ;;  %vm950_vm15 = vcmp.gt.f32.partialorder %v2194_v47, 0.0 }
 0x3de   : > { %v1783_v40 = vpop.f32.mrb[4].mxu1 }
 0x3df   : > { %v1819_v44 = vadd.f32 %v1783_v40, %v2187_v38  ;;  %v930_v46 = vpop.f32.mrb[5].mxu1  ;;  %v1682_v40 = vld [vmem:[%s2320_s3 + $0x10] sm:$0xf] }
 0x3e0   : > { %v1820_v49 = vadd.f32 %v930_v46, %v2189_v39  ;;  %v1784_v50 = vpop.f32.mrb[6].mxu1  ;;  %1848 = vmatprep.subr.msk.bf16.mxu1 %vm340_vm1, %v1682_v40  ;;  %v1206_v46 = vsel %vm340_vm1, %v1682_v40, 0 }
 0x3e1   : > { %v977_v51 = vmul.f32 1.442695, %v1819_v44  ;;  %v1821_v52 = vadd.f32 %v1784_v50, %v2191_v41  ;;  %v933_v53 = vpop.f32.mrb[7].mxu1  ;;  %vm971_vm6 = vcmp.gt.f32.partialorder %v1819_v44, 0.0  ;;  %1798 = vmatpush3.bf16.msra.mxu1 %v1206_v46 }
 0x3e2   : > { %v973_v54 = vmul.f32 1.442695, %v1820_v49  ;;  %v1822_v55 = vadd.f32 %v933_v53, %v2194_v47  ;;  %vm969_vm8 = vcmp.gt.f32.partialorder %v1820_v49, 0.0  ;;  %v1685_v53 = vld [vmem:[%s2320_s3 + $0x14] sm:$0xf] }
 0x3e3   : > { %1918 = vpow2.f32 %v977_v51  ;;  %v979_v56 = vmul.f32 1.442695, %v1821_v52  ;;  %vm972_vm7 = vcmp.gt.f32.partialorder %v1821_v52, 0.0  ;;  %1849 = vmatprep.subr.msk.bf16.mxu1 %vm340_vm1, %v1685_v53 }
 0x3e4   : > { %1920 = vpow2.f32 %v973_v54  ;;  %v975_v57 = vmul.f32 1.442695, %v1822_v55  ;;  %vm970_vm9 = vcmp.gt.f32.partialorder %v1822_v55, 0.0 }
 0x3e5   : > { %1922 = vpow2.f32 %v979_v56 }
 0x3e6   : > { %1924 = vpow2.f32 %v975_v57  ;;  %v1116_v57 = vld [vmem:[#allocation4 + $0x8] sm:$0xff] }
 0x3ed   : > { %v1919_v58 = vpop.eup %1918 }
 0x3ee   : > { %v1921_v59 = vpop.eup %1920  ;;  %v1666_v60 = vadd.f32 -1.0, %v1919_v58  ;;  %v1195_v58 = vrot.slane %v1116_v57, 7 }
 0x3ef   : > { %v1923_v61 = vpop.eup %1922  ;;  %v1664_v62 = vadd.f32 -1.0, %v1921_v59 }
 0x3f0   : > { %v1925_v63 = vpop.eup %1924  ;;  %v1667_v0 = vadd.f32 -1.0, %v1923_v61  ;;  %v987_v2 = vsel %vm971_vm6, %v1819_v44, %v1666_v60 }
 0x3f1   : > { %v1665_v1 = vadd.f32 -1.0, %v1925_v63  ;;  %v985_v4 = vsel %vm969_vm8, %v1820_v49, %v1664_v62 }
 0x3f2   : > { %v988_v3 = vsel %vm972_vm7, %v1821_v52, %v1667_v0  ;;  %v1115_v52 = vld [vmem:[#allocation4] sm:$0x80] }
 0x3f3   : > { %v990_v42 = vpack.c.bf16 %v988_v3, %v987_v2  ;;  %v986_v43 = vsel %vm970_vm9, %v1822_v55, %v1665_v1  ;;  %v1194_v55 = vrot.slane %v1115_v52, 7 }
 0x3f4   : > { %v989_v45 = vpack.c.bf16 %v986_v43, %v985_v4 }
 0x3f5   : > { %v1196_v2 = vsel %vm397_vm3, %v1194_v55, %v1195_v58 }
 0x3f6   : > { %1787 = vmatprep.mubr.msk.bf16.mxu0 %vm306_vm2, %v989_v45  ;;  %1799 = vmatprep.mubr.msk.bf16.mxu1 %vm306_vm2, %v1196_v2 }
 0x3f7   : > { %1788 = vmatmul.mubr.msk.bf16.vlgmr.msra.gmra.mrb[12].mxu0 %vm306_vm2, %v990_v42 }
 0x3f8   : > { %1792 = vmatpush3.bf16.msra.mxu0 %v1138_v37 }
 0x4ca   : > { %v1789_v5 = vpop.f32.mrb[12].mxu0 }
 0x4cb   : > { %v1053_v6 = vadd.f32 %v1789_v5, %v1670_v48  ;;  %v1044_v7 = vpop.f32.mrb[13].mxu0 }
 0x4cc   : > { %v1045_v8 = vadd.f32 %v1670_v48, %v1044_v7  ;;  %v1790_v9 = vpop.f32.mrb[14].mxu0 }
 0x4cd   : > { %v1067_v10 = vmul.f32 1.442695, %v1053_v6  ;;  %v1056_v11 = vadd.f32 %v1790_v9, %v1670_v48  ;;  %v1047_v12 = vpop.f32.mrb[15].mxu0  ;;  %vm1061_vm12 = vcmp.gt.f32.partialorder %v1053_v6, 0.0 }
 0x4ce   : > { %v1063_v13 = vmul.f32 1.442695, %v1045_v8  ;;  %v1048_v14 = vadd.f32 %v1670_v48, %v1047_v12  ;;  %vm1059_vm10 = vcmp.gt.f32.partialorder %v1045_v8, 0.0 }
 0x4cf   : > { %1926 = vpow2.f32 %v1067_v10  ;;  %v1069_v15 = vmul.f32 1.442695, %v1056_v11  ;;  %vm1062_vm13 = vcmp.gt.f32.partialorder %v1056_v11, 0.0 }
 0x4d0   : > { %1928 = vpow2.f32 %v1063_v13  ;;  %v1065_v16 = vmul.f32 1.442695, %v1048_v14  ;;  %vm1060_vm11 = vcmp.gt.f32.partialorder %v1048_v14, 0.0 }
 0x4d1   : > { %1930 = vpow2.f32 %v1069_v15  ;;  %v1297_v15 = vsel %vm340_vm1, %v1685_v53, 0 }
 0x4d2   : > { %1932 = vpow2.f32 %v1065_v16 }
 0x4d3   : > { %1934 = vpow2.f32 %v953_v30 }
 0x4d4   : > { %1936 = vpow2.f32 %v955_v31 }
 0x4d5   : > { %1938 = vpow2.f32 %v957_v32 }
 0x4d6   : > { %1940 = vpow2.f32 %v959_v33 }
 0x4d9   : > { %v1927_v17 = vpop.eup %1926 }
 0x4da   : > { %v1929_v18 = vpop.eup %1928  ;;  %v1675_v25 = vadd.f32 -1.0, %v1927_v17 }
 0x4db   : > { %v1931_v19 = vpop.eup %1930  ;;  %v1673_v20 = vadd.f32 -1.0, %v1929_v18 }
 0x4dc   : > { %v1933_v22 = vpop.eup %1932  ;;  %v1676_v27 = vadd.f32 -1.0, %v1931_v19  ;;  %v1077_v28 = vsel %vm1061_vm12, %v1053_v6, %v1675_v25  ;;  %v1118_v6 = vld [vmem:[#allocation4 + $0x8] sm:$0xf8] }
 0x4dd   : > { %v1075_v23 = vsel %vm1059_vm10, %v1045_v8, %v1673_v20  ;;  %v1674_v24 = vadd.f32 -1.0, %v1933_v22  ;;  %v1935_v36 = vpop.eup %1934  ;;  %v1265_v7 = vshrl.u32 %v1118_v6, 16  ;;  %v1268_v8 = vshll.u32 %v1118_v6, 16 }
 0x4de   : > { %1083 = vrot.lane.b32.xlu0 %v1075_v23, %s2007_s10  ;;  %v1078_v29 = vsel %vm1062_vm13, %v1056_v11, %v1676_v27  ;;  %v1937_v44 = vpop.eup %1936  ;;  %v1660_v50 = vadd.f32 -1.0, %v1935_v36 }
 0x4df   : > { %v1076_v26 = vsel %vm1060_vm11, %v1048_v14, %v1674_v24  ;;  %v1939_v49 = vpop.eup %1938  ;;  %v1661_v51 = vadd.f32 -1.0, %v1937_v44 }
 0x4e0   : > { %1085 = vrot.lane.b32.xlu1 %v1076_v26, %s2007_s10  ;;  %v1941_v54 = vpop.eup %1940  ;;  %v965_v59 = vsel %vm949_vm14, %v2189_v39, %v1660_v50  ;;  %v1662_v62 = vadd.f32 -1.0, %v1939_v49 }
 0x4e1   : > { %v966_v60 = vsel %vm950_vm15, %v2194_v47, %v1661_v51  ;;  %v1663_v63 = vadd.f32 -1.0, %v1941_v54 }
 0x4e2   : > { %1087 = vrot.lane.b32.xlu0 %v1077_v28, %s2007_s10  ;;  %v967_v42 = vsel %vm951_vm0, %v2187_v38, %v1662_v62  ;;  %v1267_v38 = vrot.slane %v1265_v7, 3 }
 0x4e3   : > { %v968_v39 = vsel %vm952_vm4, %v2191_v41, %v1663_v63  ;;  %v1270_v41 = vrot.slane %v1268_v8, 4 }
 0x4e4   : > { %1089 = vrot.lane.b32.xlu1 %v1078_v29, %s2007_s10  ;;  %v1696_v29 = vld [vmem:[%s2321_s4 + $0x8] sm:$0xf] }
 0x4e5   : > { %v1271_v17 = vor.u32 %v1270_v41, %v1267_v38  ;;  %1850 = vmatprep.subr.msk.bf16.mxu0 %vm340_vm1, %v1696_v29  ;;  %v1411_v30 = vsel %vm340_vm1, %v1696_v29, 0 }
 0x550   : > { %v1084_v56 = vpop.permute.xlu0 %1083 }
 0x551   : > { %v1095_v0 = vadd.f32 %v1084_v56, %v965_v59 }
 0x552   : > { %v1086_v61 = vpop.permute.xlu1 %1085 }
 0x553   : > { %v1096_v1 = vadd.f32 %v1086_v61, %v966_v60 }
 0x554   : > { %v1088_v3 = vpop.permute.xlu0 %1087 }
 0x555   : > { %v1099_v4 = vpack.c.bf16 %v1096_v1, %v1095_v0  ;;  %v1097_v43 = vadd.f32 %v1088_v3, %v967_v42 }
 0x556   : > { %v1090_v47 = vpop.permute.xlu1 %1089 }
 0x557   : > { %v1098_v45 = vadd.f32 %v1090_v47, %v968_v39  ;;  %1107 = vrot.lane.b32.xlu0 %v1099_v4, %s2008_s16 }
 0x559   : > { %v1100_v48 = vpack.c.bf16 %v1098_v45, %v1097_v43 }
 0x55b   : > { %1109 = vrot.lane.b32.xlu1 %v1100_v48, %s2008_s16  ;;  %v1698_v48 = vld [vmem:[%s2322_s5 + $0x2] ss:$0 sm:$0xff] }
 0x5c9   : > { %v1108_v5 = vpop.permute.xlu0 %1107 }
 0x5ca   : > { %1113 = vst.msk [vmem:[#allocation4 + $0x10] sm:$0xff] %vm306_vm2, %v1108_v5  ;;  %1793 = vmatprep.mubr.msk.bf16.mxu0 %vm306_vm2, %v1108_v5 }
 0x5cd   : > { %v1110_v9 = vpop.permute.xlu1 %1109 }
 0x5ce   : > { %1114 = vst.msk [vmem:[#allocation4 + $0x18] sm:$0xff] %vm306_vm2, %v1110_v9  ;;  %1794 = vmatmul.mubr.msk.bf16.vlgmr.msra.gmra.mrb[16].mxu0 %vm306_vm2, %v1110_v9 }
 0x5cf   : > { %1810 = vmatpush3.bf16.msra.mxu0 %v1411_v30 }
 0x5d1   : > { %v1117_v10 = vld [vmem:[#allocation4 + $0x10] sm:$0x7f] }
 0x5d2   : > { %v1119_v11 = vld [vmem:[#allocation4 + $0x10] sm:$0xff]  ;;  %v1197_v12 = vrot.slane %v1117_v10, 7 }
 0x5d3   : > { %v1273_v13 = vshrl.u32 %v1119_v11, 16  ;;  %v1276_v14 = vshll.u32 %v1119_v11, 16 }
 0x5d4   : > { %v1198_v16 = vsel %vm397_vm3, %v1195_v58, %v1197_v12 }
 0x5d5   : > { %v1275_v18 = vrot.slane %v1273_v13, 3  ;;  %v1278_v19 = vrot.slane %v1276_v14, 4  ;;  %1800 = vmatmul.mubr.msk.bf16.vlgmr.msra.gmra.mrb[8].mxu1 %vm306_vm2, %v1198_v16  ;;  %v1120_v20 = vld [vmem:[#allocation4 + $0x18] sm:$0xf] }
 0x5d6   : > { %1804 = vmatpush3.bf16.msra.mxu1 %v1297_v15  ;;  %v1282_v22 = vshrl.u32 %v1120_v20, 16  ;;  %v1285_v23 = vshll.u32 %v1120_v20, 16 }
 0x5d7   : > { %v1279_v21 = vor.u32 %v1278_v19, %v1275_v18 }
 0x5d8   : > { %v1284_v25 = vrot.slane %v1282_v22, 3  ;;  %v1287_v26 = vrot.slane %v1285_v23, 4 }
 0x5d9   : > { %v1280_v24 = vsel %vm1263_vm5, %v1271_v17, %v1279_v21 }
 0x5da   : > { %1805 = vmatprep.mubr.msk.bf16.mxu1 %vm306_vm2, %v1280_v24  ;;  %v1288_v27 = vor.u32 %v1287_v26, %v1284_v25 }
 0x5dc   : > { %v1289_v28 = vsel %vm1263_vm5, %v1279_v21, %v1288_v27 }
 0x5e1   : > { %1806 = vmatmul.mubr.msk.bf16.vlgmr.msra.gmra.mrb[8].mxu1 %vm306_vm2, %v1289_v28 }
 0x6a1   : > { %v1795_v31 = vpop.f32.mrb[16].mxu0 }
 0x6a2   : > { %v1174_v32 = vpop.f32.mrb[17].mxu0  ;;  %v2257_v36 = vadd.f32 %v1795_v31, %v1679_v35 }
 0x6a3   : > { %v1796_v33 = vpop.f32.mrb[18].mxu0  ;;  %v2259_v37 = vadd.f32 %v1679_v35, %v1174_v32 }
 0x6a4   : > { %v1177_v34 = vpop.f32.mrb[19].mxu0  ;;  %v2261_v44 = vadd.f32 %v1796_v33, %v1679_v35  ;;  %v1360_v29 = vmul.f32 1.442695, %v2257_v36  ;;  %vm1354_vm14 = vcmp.gt.f32.partialorder %v2257_v36, 0.0 }
 0x6a5   : > { %v2264_v50 = vadd.f32 %v1679_v35, %v1177_v34  ;;  %v1356_v27 = vmul.f32 1.442695, %v2259_v37  ;;  %vm1352_vm12 = vcmp.gt.f32.partialorder %v2259_v37, 0.0 }
 0x6a6   : > { %v1362_v30 = vmul.f32 1.442695, %v2261_v44  ;;  %vm1355_vm15 = vcmp.gt.f32.partialorder %v2261_v44, 0.0 }
 0x6a7   : > { %v1358_v28 = vmul.f32 1.442695, %v2264_v50  ;;  %vm1353_vm13 = vcmp.gt.f32.partialorder %v2264_v50, 0.0 }
 0x6b4   : > { %v1807_v40 = vpop.f32.mrb[8].mxu1 }
 0x6b5   : > { %v1823_v46 = vadd.f32 %v1807_v40, %v2257_v36  ;;  %v1333_v49 = vpop.f32.mrb[9].mxu1 }
 0x6b6   : > { %v1824_v51 = vadd.f32 %v1333_v49, %v2259_v37  ;;  %v1808_v52 = vpop.f32.mrb[10].mxu1 }
 0x6b7   : > { %v1380_v53 = vmul.f32 1.442695, %v1823_v46  ;;  %v1825_v54 = vadd.f32 %v1808_v52, %v2261_v44  ;;  %v1336_v55 = vpop.f32.mrb[11].mxu1  ;;  %vm1374_vm1 = vcmp.gt.f32.partialorder %v1823_v46, 0.0 }
 0x6b8   : > { %v1376_v56 = vmul.f32 1.442695, %v1824_v51  ;;  %v1826_v57 = vadd.f32 %v1336_v55, %v2264_v50  ;;  %vm1372_vm6 = vcmp.gt.f32.partialorder %v1824_v51, 0.0 }
 0x6b9   : > { %1942 = vpow2.f32 %v1380_v53  ;;  %v1382_v58 = vmul.f32 1.442695, %v1825_v54  ;;  %vm1375_vm3 = vcmp.gt.f32.partialorder %v1825_v54, 0.0 }
 0x6ba   : > { %1944 = vpow2.f32 %v1376_v56  ;;  %v1378_v59 = vmul.f32 1.442695, %v1826_v57  ;;  %vm1373_vm7 = vcmp.gt.f32.partialorder %v1826_v57, 0.0 }
 0x6bb   : > { %1946 = vpow2.f32 %v1382_v58 }
 0x6bc   : > { %1948 = vpow2.f32 %v1378_v59 }
 0x6c3   : > { %v1943_v60 = vpop.eup %1942 }
 0x6c4   : > { %v1945_v61 = vpop.eup %1944  ;;  %v1694_v62 = vadd.f32 -1.0, %v1943_v60 }
 0x6c5   : > { %v1947_v63 = vpop.eup %1946  ;;  %v1692_v0 = vadd.f32 -1.0, %v1945_v61 }
 0x6c6   : > { %v1949_v1 = vpop.eup %1948  ;;  %v1695_v2 = vadd.f32 -1.0, %v1947_v63  ;;  %v1390_v4 = vsel %vm1374_vm1, %v1823_v46, %v1694_v62 }
 0x6c7   : > { %v1693_v3 = vadd.f32 -1.0, %v1949_v1  ;;  %v1388_v39 = vsel %vm1372_vm6, %v1824_v51, %v1692_v0 }
 0x6c8   : > { %v1391_v42 = vsel %vm1375_vm3, %v1825_v54, %v1695_v2 }
 0x6c9   : > { %v1393_v47 = vpack.c.bf16 %v1391_v42, %v1390_v4  ;;  %v1389_v43 = vsel %vm1373_vm7, %v1826_v57, %v1693_v3 }
 0x6ca   : > { %v1392_v45 = vpack.c.bf16 %v1389_v43, %v1388_v39 }
 0x6cc   : > { %1811 = vmatprep.mubr.msk.bf16.mxu0 %vm306_vm2, %v1392_v45 }
 0x6cd   : > { %1812 = vmatmul.mubr.msk.bf16.vlgmr.msra.gmra.mrb[20].mxu0 %vm306_vm2, %v1393_v47 }
 0x7a0   : > { %v1813_v5 = vpop.f32.mrb[20].mxu0 }
 0x7a1   : > { %v1456_v6 = vadd.f32 %v1813_v5, %v1698_v48  ;;  %v1447_v7 = vpop.f32.mrb[21].mxu0 }
 0x7a2   : > { %v1448_v8 = vadd.f32 %v1698_v48, %v1447_v7  ;;  %v1814_v9 = vpop.f32.mrb[22].mxu0 }
 0x7a3   : > { %v1470_v38 = vmul.f32 1.442695, %v1456_v6  ;;  %v1459_v41 = vadd.f32 %v1814_v9, %v1698_v48  ;;  %v1450_v10 = vpop.f32.mrb[23].mxu0  ;;  %vm1464_vm10 = vcmp.gt.f32.partialorder %v1456_v6, 0.0 }
 0x7a4   : > { %v1466_v11 = vmul.f32 1.442695, %v1448_v8  ;;  %v1451_v12 = vadd.f32 %v1698_v48, %v1450_v10  ;;  %vm1462_vm8 = vcmp.gt.f32.partialorder %v1448_v8, 0.0 }
 0x7a5   : > { %1950 = vpow2.f32 %v1470_v38  ;;  %v1472_v13 = vmul.f32 1.442695, %v1459_v41  ;;  %vm1465_vm11 = vcmp.gt.f32.partialorder %v1459_v41, 0.0 }
 0x7a6   : > { %1952 = vpow2.f32 %v1466_v11  ;;  %v1468_v14 = vmul.f32 1.442695, %v1451_v12  ;;  %vm1463_vm9 = vcmp.gt.f32.partialorder %v1451_v12, 0.0 }
 0x7a7   : > { %1954 = vpow2.f32 %v1472_v13 }
 0x7a8   : > { %1956 = vpow2.f32 %v1468_v14 }
 0x7a9   : > { %1958 = vpow2.f32 %v1356_v27 }
 0x7aa   : > { %1960 = vpow2.f32 %v1358_v28 }
 0x7ab   : > { %1962 = vpow2.f32 %v1360_v29 }
 0x7ac   : > { %1964 = vpow2.f32 %v1362_v30 }
 0x7af   : > { %v1951_v15 = vpop.eup %1950 }
 0x7b0   : > { %v1953_v16 = vpop.eup %1952  ;;  %v1703_v22 = vadd.f32 -1.0, %v1951_v15 }
 0x7b1   : > { %v1955_v17 = vpop.eup %1954  ;;  %v1701_v18 = vadd.f32 -1.0, %v1953_v16 }
 0x7b2   : > { %v1957_v19 = vpop.eup %1956  ;;  %v1704_v24 = vadd.f32 -1.0, %v1955_v17  ;;  %v1480_v25 = vsel %vm1464_vm10, %v1456_v6, %v1703_v22 }
 0x7b3   : > { %v1478_v20 = vsel %vm1462_vm8, %v1448_v8, %v1701_v18  ;;  %v1702_v21 = vadd.f32 -1.0, %v1957_v19  ;;  %v1959_v31 = vpop.eup %1958 }
 0x7b4   : > { %1486 = vrot.lane.b32.xlu0 %v1478_v20, %s2007_s10  ;;  %v1481_v26 = vsel %vm1465_vm11, %v1459_v41, %v1704_v24  ;;  %v1961_v32 = vpop.eup %1960  ;;  %v1688_v33 = vadd.f32 -1.0, %v1959_v31 }
 0x7b5   : > { %v1479_v23 = vsel %vm1463_vm9, %v1451_v12, %v1702_v21  ;;  %v1963_v34 = vpop.eup %1962  ;;  %v1689_v35 = vadd.f32 -1.0, %v1961_v32 }
 0x7b6   : > { %1488 = vrot.lane.b32.xlu1 %v1479_v23, %s2007_s10  ;;  %v1965_v40 = vpop.eup %1964  ;;  %v1368_v46 = vsel %vm1352_vm12, %v2259_v37, %v1688_v33  ;;  %v1690_v51 = vadd.f32 -1.0, %v1963_v34 }
 0x7b7   : > { %v1369_v53 = vsel %vm1353_vm13, %v2264_v50, %v1689_v35  ;;  %v1691_v55 = vadd.f32 -1.0, %v1965_v40 }
 0x7b8   : > { %1490 = vrot.lane.b32.xlu0 %v1480_v25, %s2007_s10  ;;  %v1370_v57 = vsel %vm1354_vm14, %v2257_v36, %v1690_v51 }
 0x7b9   : > { %v1371_v50 = vsel %vm1355_vm15, %v2261_v44, %v1691_v55 }
 0x7ba   : > { %1492 = vrot.lane.b32.xlu1 %v1481_v26, %s2007_s10 }
 0x826   : > { %v1487_v49 = vpop.permute.xlu0 %1486 }
 0x827   : > { %v1498_v52 = vadd.f32 %v1487_v49, %v1368_v46 }
 0x828   : > { %v1489_v54 = vpop.permute.xlu1 %1488 }
 0x829   : > { %v1499_v56 = vadd.f32 %v1489_v54, %v1369_v53  ;;  %1506 = vrot.lane.b32.xlu0 %v1498_v52, %s2008_s16 }
 0x82a   : > { %v1491_v37 = vpop.permute.xlu0 %1490 }
 0x82b   : > { %v1500_v58 = vadd.f32 %v1491_v37, %v1370_v57  ;;  %1508 = vrot.lane.b32.xlu1 %v1499_v56, %s2008_s16 }
 0x82c   : > { %v1493_v59 = vpop.permute.xlu1 %1492 }
 0x82d   : > { %v1501_v60 = vadd.f32 %v1493_v59, %v1371_v50  ;;  %1510 = vrot.lane.b32.xlu0 %v1500_v58, %s2008_s16 }
 0x82f   : > { %1512 = vrot.lane.b32.xlu1 %v1501_v60, %s2008_s16 }
 0x89b   : > { %v1507_v61 = vpop.permute.xlu0 %1506 }
 0x89c   : > { %1518 = vst.msk [vmem:[%s2083_s14] sm:$0xff] %vm306_vm2, %v1507_v61 }
 0x89d   : > { %v1509_v62 = vpop.permute.xlu1 %1508 }
 0x89e   : > { %1519 = vst.msk [vmem:[%s2083_s14 + $0x8] sm:$0xff] %vm306_vm2, %v1509_v62 }
 0x89f   : > { %v1511_v36 = vpop.permute.xlu0 %1510 }
 0x8a0   : > { %1520 = vst.msk [vmem:[%s2083_s14 + $0x10] sm:$0xff] %vm306_vm2, %v1511_v36 }
 0x8a1   : > { %v1513_v63 = vpop.permute.xlu1 %1512 }
 0x8a2   : > { %1521 = vst.msk [vmem:[%s2083_s14 + $0x18] sm:$0xff] %vm306_vm2, %v1513_v63 }
 0x8a3 PF: > { %s16_s25 = sadd.s32 1, %s2004_s25   ;;  %s2324_s21 = smov %s1996_s23 }
 0x8a4   : > { %p13_p8 = scmp.ge.s32.totalorder %s16_s25, 6   ;;  %s2325_s22 = smov %s2000_s24 }
 0x8a5   : > { %s2326_s23 = smov %s2329_s26  ;;  %s2327_s24 = smov %s2333_s27 }
 0x8a6   :  { %15 = sbr.rel (!%p13_p8) target bundleno = 3 (0x3), region = 91 }

</bundles_post_ra>
